<compile_context>
chip_gen: v5e
topology: v5e:2x2
jax: 0.10.0
libtpu: 0.0.40
codegen_flags: <defaults>
</compile_context>

<pallas_src>
import functools

import jax
import jax.numpy as jnp
from jax.experimental import pallas as pl
from jax.experimental.pallas import tpu as pltpu


def _add_conv1x1_kernel(a_ref, b_ref, w_ref, o_ref, *scratch, j_axis, cache_sum):
    # o[tco, HW] = w[tco, Cin] @ (a + b)[Cin, HW]
    # bf16 MXU operands, f32 accumulation, cast to o_ref.dtype on store.
    if cache_sum:
        # Sequential multi-step grid: compute the bf16 sum once (on the first
        # Cout tile of each batch element) and reuse it from VMEM afterwards.
        s_ref = scratch[0]

        @pl.when(pl.program_id(j_axis) == 0)
        def _():
            s_ref[...] = (a_ref[...] + b_ref[...]).astype(s_ref.dtype)

        s = s_ref[...]
    else:
        s = (a_ref[...] + b_ref[...]).astype(jnp.bfloat16)

    o_ref[...] = jnp.dot(
        w_ref[...], s, preferred_element_type=jnp.float32
    ).astype(o_ref.dtype)


def add_conv1x1(x278, x264, weight, *, out_dtype=None):
    """x278, x264: [N, Cin, H, W] (NCHW, like PyTorch);
    weight: [Cout, Cin, 1, 1] (PyTorch Conv2d weight, bias=False).
    Returns [N, Cout, H, W] in `out_dtype` (default: x278.dtype)."""
    N, Cin, H, W = x278.shape
    Cout = weight.shape[0]
    HW = H * W
    if out_dtype is None:
        out_dtype = x278.dtype

    # [Cout, Cin, 1, 1] -> [Cout, Cin]; pre-cast to bf16 once so the dominant
    # weight DMA is halved (f32 accumulation keeps abs error at the 1e-2 level).
    w = weight.reshape(Cout, Cin).astype(jnp.bfloat16)

    # ---- generation-aware Cout tiling --------------------------------------
    kind = jax.devices()[0].device_kind.lower()
    is_v7 = "7" in kind                          # v7x: 2 TensorCores per chip
    is_v6 = ("v6" in kind) or ("trillium" in kind)

    if Cout % 2 == 0 and (Cout // 2) % 16 == 0:
        # v6e: a single step wins (per-step overhead ~0.35us vs ~0.27us overlap).
        n_j = 1 if is_v6 else 2
    else:
        n_j = 1
    tco = Cout // n_j

    # Only CORE_PARALLEL actually changes codegen / engages v7x's 2nd core.
    use_core_parallel = is_v7 and n_j > 1 and N == 1
    # On a sequential multi-step grid, cache the bf16 sum in VMEM scratch.
    cache_sum = (n_j > 1) and not use_core_parallel

    # ---- layouts & specs (free reshapes only, no XLA transposes) -----------
    if N == 1:
        a = x278.reshape(Cin, HW)
        b = x264.reshape(Cin, HW)
        grid = (n_j,)
        in_specs = [
            pl.BlockSpec((Cin, HW), lambda j: (0, 0)),     # A: resident
            pl.BlockSpec((Cin, HW), lambda j: (0, 0)),     # B: resident
            pl.BlockSpec((tco, Cin), lambda j: (j, 0)),    # weight tile
        ]
        out_specs = pl.BlockSpec((tco, HW), lambda j: (j, 0))
        out_shape = jax.ShapeDtypeStruct((Cout, HW), out_dtype)
        dim_sem = (pltpu.CORE_PARALLEL if use_core_parallel else pltpu.ARBITRARY,)
    else:
        # Batched path: Squeezed batch grid axis keeps everything a reshape.
        a = x278.reshape(N, Cin, HW)
        b = x264.reshape(N, Cin, HW)
        grid = (N, n_j)
        in_specs = [
            pl.BlockSpec((pl.Squeezed(), Cin, HW), lambda n, j: (n, 0, 0)),
            pl.BlockSpec((pl.Squeezed(), Cin, HW), lambda n, j: (n, 0, 0)),
            pl.BlockSpec((tco, Cin), lambda n, j: (j, 0)),
        ]
        out_specs = pl.BlockSpec((pl.Squeezed(), tco, HW), lambda n, j: (n, j, 0))
        out_shape = jax.ShapeDtypeStruct((N, Cout, HW), out_dtype)
        dim_sem = (pltpu.ARBITRARY, pltpu.ARBITRARY)

    scratch_shapes = [pltpu.VMEM((Cin, HW), jnp.bfloat16)] if cache_sum else []
    j_axis = len(grid) - 1

    # Advisory cost hint: kernel is ~1 us and memory-bound; a correct hint lets
    # XLA schedule neighbouring HLO around/over the custom call.
    cost = pl.CostEstimate(
        flops=2 * N * Cout * Cin * HW,
        transcendentals=0,
        bytes_accessed=(
            2 * N * Cin * HW * x278.dtype.itemsize   # A + B
            + Cout * Cin * 2                         # bf16 weight
            + N * Cout * HW * jnp.dtype(out_dtype).itemsize  # output
        ),
    )

    def build(dim_semantics):
        return pl.pallas_call(
            functools.partial(
                _add_conv1x1_kernel, j_axis=j_axis, cache_sum=cache_sum
            ),
            out_shape=out_shape,
            grid_spec=pltpu.PrefetchScalarGridSpec(
                num_scalar_prefetch=0,
                grid=grid,
                in_specs=in_specs,
                out_specs=out_specs,
                scratch_shapes=scratch_shapes,
            ),
            compiler_params=pltpu.CompilerParams(
                dimension_semantics=dim_semantics
            ),
            cost_estimate=cost,
        )

    try:
        out_flat = build(dim_sem)(a, b, w)
    except Exception:
        if use_core_parallel:
            # TODO(synk): CORE_PARALLEL rejected on this chip/runtime; fall back
            # to a sequential grid (identical results, v7x loses the 2nd core).
            out_flat = build((pltpu.ARBITRARY,))(a, b, w)
        else:
            raise

    # [Cout, HW] / [N, Cout, HW] -> NCHW (free reshapes).
    if N == 1:
        return out_flat.reshape(1, Cout, H, W)
    return out_flat.reshape(N, Cout, H, W)


if __name__ == "__main__":
    key = jax.random.PRNGKey(0)
    k1, k2, k3 = jax.random.split(key, 3)

    # Shapes implied by the module: N=1, Cin=160 -> Cout=960, 14x14 spatial.
    N, Cin, Cout, H, W = 1, 160, 960, 14, 14
    x278 = jax.random.normal(k1, (N, Cin, H, W), dtype=jnp.float32)
    x264 = jax.random.normal(k2, (N, Cin, H, W), dtype=jnp.float32)
    # Deterministic Conv2d weight init (synthetic; no checkpoint).
    weight = jax.random.normal(k3, (Cout, Cin, 1, 1), dtype=jnp.float32) * 0.05

    out = jax.block_until_ready(add_conv1x1(x278, x264, weight))

    # Pure-JAX f32 reference of the module's forward pass.
    ref = jnp.einsum("nchw,oc->nohw", x278 + x264, weight.reshape(Cout, Cin))
    assert out.shape == (N, Cout, H, W)
    # bf16 MXU operands over a Cin=160 reduction -> slightly loose tolerance.
    assert jnp.allclose(out, ref, atol=5e-2, rtol=5e-2), float(
        jnp.max(jnp.abs(out - ref))
    )

    # Exercise the batched (N>1) path: Squeezed batch grid axis, no transposes.
    N2, H2, W2 = 2, 8, 8
    xa = jax.random.normal(k1, (N2, Cin, H2, W2), dtype=jnp.float32)
    xb = jax.random.normal(k2, (N2, Cin, H2, W2), dtype=jnp.float32)
    out2 = jax.block_until_ready(add_conv1x1(xa, xb, weight))
    ref2 = jnp.einsum("nchw,oc->nohw", xa + xb, weight.reshape(Cout, Cin))
    assert out2.shape == (N2, Cout, H2, W2)
    assert jnp.allclose(out2, ref2, atol=5e-2, rtol=5e-2), float(
        jnp.max(jnp.abs(out2 - ref2))
    )

    print("KERNEL_OK")
</pallas_src>

<mosaic_0001>
module attributes {stable_mosaic.version = 11 : i64} {
  func.func @_add_conv1x1_kernel(%arg0: i32, %arg1: memref<160x196xf32, #tpu.memory_space<vmem>>, %arg2: memref<160x196xf32, #tpu.memory_space<vmem>>, %arg3: memref<480x160xbf16, #tpu.memory_space<vmem>>, %arg4: memref<480x196xf32, #tpu.memory_space<vmem>>, %arg5: memref<160x196xbf16, #tpu.memory_space<vmem>>) attributes {dimension_semantics = [#tpu.dimension_semantics<arbitrary>], iteration_bounds = array<i64: 2>, scalar_prefetch = 0 : i64, scratch_operands = 1 : i64, tpu.core_type = #tpu.core_type<tc>, window_params = [{pipeline_mode = #tpu.pipeline_mode<synchronous>, transform_indices = @transform_0, window_bounds = array<i64: 160, 196>}, {pipeline_mode = #tpu.pipeline_mode<synchronous>, transform_indices = @transform_1, window_bounds = array<i64: 160, 196>}, {transform_indices = @transform_2, window_bounds = array<i64: 480, 160>}, {transform_indices = @transform_3, window_bounds = array<i64: 480, 196>}]} {
    %c0_i32 = arith.constant 0 : i32
    %0 = arith.cmpi eq, %arg0, %c0_i32 : i32
    %1 = arith.extui %0 : i1 to i32
    %c0_i32_0 = arith.constant 0 : i32
    %2 = arith.cmpi ne, %1, %c0_i32_0 : i32
    scf.if %2 {
      %c0_6 = arith.constant 0 : index
      %c0_7 = arith.constant 0 : index
      %7 = vector.load %arg1[%c0_6, %c0_7] : memref<160x196xf32, #tpu.memory_space<vmem>>, vector<160x196xf32>
      %c0_8 = arith.constant 0 : index
      %c0_9 = arith.constant 0 : index
      %8 = vector.load %arg2[%c0_8, %c0_9] : memref<160x196xf32, #tpu.memory_space<vmem>>, vector<160x196xf32>
      %9 = arith.addf %7, %8 : vector<160x196xf32>
      %10 = arith.truncf %9 : vector<160x196xf32> to vector<160x196xbf16>
      %c0_10 = arith.constant 0 : index
      %c0_11 = arith.constant 0 : index
      %11 = vector.load %arg5[%c0_10, %c0_11] : memref<160x196xbf16, #tpu.memory_space<vmem>>, vector<160x196xbf16>
      tpu.vector_store %arg5[%c0_10, %c0_11], %10 {strides = array<i32>} : memref<160x196xbf16, #tpu.memory_space<vmem>>, vector<160x196xbf16>,
    } else {
    }
    %c0 = arith.constant 0 : index
    %c0_1 = arith.constant 0 : index
    %3 = vector.load %arg5[%c0, %c0_1] : memref<160x196xbf16, #tpu.memory_space<vmem>>, vector<160x196xbf16>
    %c0_2 = arith.constant 0 : index
    %c0_3 = arith.constant 0 : index
    %4 = vector.load %arg3[%c0_2, %c0_3] : memref<480x160xbf16, #tpu.memory_space<vmem>>, vector<480x160xbf16>
    %cst = arith.constant dense<0.000000e+00> : vector<480x196xf32>
    %5 = tpu.matmul %4, %3, %cst {dimension_numbers = #tpu.dot_dimension_numbers<[1], [0], [0], [1], [0, 0, 1, 1], [], []>} : vector<480x160xbf16>, vector<160x196xbf16>, vector<480x196xf32> -> vector<480x196xf32>
    %c0_4 = arith.constant 0 : index
    %c0_5 = arith.constant 0 : index
    %6 = vector.load %arg4[%c0_4, %c0_5] : memref<480x196xf32, #tpu.memory_space<vmem>>, vector<480x196xf32>
    tpu.vector_store %arg4[%c0_4, %c0_5], %5 {strides = array<i32>} : memref<480x196xf32, #tpu.memory_space<vmem>>, vector<480x196xf32>,
    return
  }
  func.func @transform_0(%arg0: i32) -> (i32, i32) {
    %c0_i32 = arith.constant 0 : i32
    %c0_i32_0 = arith.constant 0 : i32
    %c0_i32_1 = arith.constant 0 : i32
    return %c0_i32, %c0_i32_0 : i32, i32
  }
  func.func @transform_1(%arg0: i32) -> (i32, i32) {
    %c0_i32 = arith.constant 0 : i32
    %c0_i32_0 = arith.constant 0 : i32
    %c0_i32_1 = arith.constant 0 : i32
    return %c0_i32, %c0_i32_0 : i32, i32
  }
  func.func @transform_2(%arg0: i32) -> (i32, i32) {
    %c0_i32 = arith.constant 0 : i32
    %c0_i32_0 = arith.constant 0 : i32
    return %arg0, %c0_i32 : i32, i32
  }
  func.func @transform_3(%arg0: i32) -> (i32, i32) {
    %c0_i32 = arith.constant 0 : i32
    %c0_i32_0 = arith.constant 0 : i32
    return %arg0, %c0_i32 : i32, i32
  }
}

</mosaic_0001>

<bundles_post_ra>
// kernel: tpu_custom_call.1
= control target key start
LH: loop header
LB: loop body
LE: loop exit
PB: predicated region body
PF: predicated region fallthrough
CT: control target
= control target key end

     0   :  { %s2213_s12 = smov 0   ;;  %s2878_s0 = inlined_call_operand.vmem [shape: f32[160,196], index: 0, kind: input, shape index: {}]   ;;  %s2879_s1 = inlined_call_operand.vmem [shape: f32[160,196], index: 1, kind: input, shape index: {}]   ;;  %s2880_s2 = inlined_call_operand.vmem [shape: bf16[960,160], index: 2, kind: input, shape index: {}]   ;;  %s2881_s3 = inlined_call_operand.vmem [shape: f32[960,196], index: 3, kind: output, shape index: {}]  }
   0x1 LB: > { %s1703_s13 = sadd.s32 4294967295, %s2191_s12   ;;  %p1707_p0 = scmp.ge.s32.totalorder %s2191_s12, 1  ;;  %s2191_s12 = sphi %s2213_s12, %s13_s12  }
   0x2   : > { %p139_p1 = scmp.lt.s32.totalorder %s2191_s12, 3 }
   0x4   : > { %p140_p2 = pnand %p1707_p0, %p139_p1 }
   0x5   : > { %s165_s14 = smul.u32 (!%p140_p2), 60, %s1703_s13  ;;  %p1712_p4 = scmp.ne.s32.totalorder (!%p140_p2), %s1703_s13, 0 }
   0x6   : > { %143 = sbr.rel (%p140_p2) target bundleno = 691 (0x2b3), region = 32 }
   0x7   : > { %p166_p3 = scmp.lt.s32.totalorder (!%p140_p2), %s165_s14, 119 }
   0xb   : > { %s2885_s14 = smov (!%p166_p3, %s165_s14), 119  ;;  %183 = sbr.rel (%p1712_p4) target bundleno = 49 (0x31), region = 36 }
   0xc   : > { %s2095_s15 = sshll.u32 %s2885_s14, 3  ;;  %s2096_s16 = sshll.u32 %s2885_s14, 4 }
   0xd   : > { %s2224_s19 = scalar_lea.vmem %s2880_s2, %s2095_s15  ;;  %s2229_s22 = scalar_lea.vmem %s2881_s3, %s2096_s16 }
  0x10   : > { %v184_v0 = vld [vmem:[%s2878_s0] sm:$0xff]  ;;  %v185_v1 = vld [vmem:[%s2878_s0 + $0x8] sm:$0xff]  ;;  %vm324_vm0 = vcmask 1043456   ;;  %vm325_vm1 = vcmask 556036   ;;  %v186_v6 = vld [vmem:[%s2878_s0 + $0x10] sm:$0xff] }
  0x11   : > { %v224_v2 = vld [vmem:[%s2879_s1] sm:$0xff]  ;;  %v225_v3 = vld [vmem:[%s2879_s1 + $0x8] sm:$0xff]  ;;  %vm2243_vm2 = vmor %vm325_vm1, %vm324_vm0 }
  0x12   : > { %v264_v4 = vadd.f32 %v224_v2, %v184_v0  ;;  %v265_v7 = vadd.f32 %v225_v3, %v185_v1  ;;  %v187_v8 = vld [vmem:[%s2878_s0 + $0x18] sm:$0xff]  ;;  %v226_v9 = vld [vmem:[%s2879_s1 + $0x10] sm:$0xff]  ;;  %v188_v13 = vld [vmem:[%s2878_s0 + $0x20] sm:$0xff] }
  0x13   : > { %v227_v10 = vld [vmem:[%s2879_s1 + $0x18] sm:$0xff]  ;;  %v266_v11 = vadd.f32 %v226_v9, %v186_v6  ;;  %v189_v14 = vld [vmem:[%s2878_s0 + $0x28] sm:$0xff]  ;;  %v228_v15 = vld [vmem:[%s2879_s1 + $0x20] sm:$0xff] }
  0x14   : > { %v267_v12 = vadd.f32 %v227_v10, %v187_v8  ;;  %v304_v16 = vpack.c.bf16 %v265_v7, %v264_v4  ;;  %v229_v17 = vld [vmem:[%s2879_s1 + $0x28] sm:$0xff]  ;;  %v268_v18 = vadd.f32 %v228_v15, %v188_v13  ;;  %v190_v19 = vld [vmem:[%s2878_s0 + $0x30] sm:$0xff]  ;;  %v191_v20 = vld [vmem:[%s2878_s0 + $0x38] sm:$0xff] }
  0x15   : > { %v269_v22 = vadd.f32 %v229_v17, %v189_v14  ;;  %v230_v23 = vld [vmem:[%s2879_s1 + $0x30] sm:$0xff]  ;;  %v231_v24 = vld [vmem:[%s2879_s1 + $0x38] sm:$0xff]  ;;  %v192_v25 = vld [vmem:[%s2878_s0 + $0x40] sm:$0xff] }
  0x16   : > { %v305_v21 = vpack.c.bf16 %v267_v12, %v266_v11  ;;  %327 = vst.msk [vmem:[#allocation2] sm:$0xff] %vm2243_vm2, %v304_v16  ;;  %v270_v26 = vadd.f32 %v230_v23, %v190_v19  ;;  %v271_v27 = vadd.f32 %v231_v24, %v191_v20  ;;  %v193_v28 = vld [vmem:[%s2878_s0 + $0x48] sm:$0xff]  ;;  %v232_v29 = vld [vmem:[%s2879_s1 + $0x40] sm:$0xff]  ;;  %v194_v34 = vld [vmem:[%s2878_s0 + $0x50] sm:$0xff] }
  0x17   : > { %v233_v30 = vld [vmem:[%s2879_s1 + $0x48] sm:$0xff]  ;;  %v306_v31 = vpack.c.bf16 %v269_v22, %v268_v18  ;;  %v272_v32 = vadd.f32 %v232_v29, %v192_v25  ;;  %v195_v35 = vld [vmem:[%s2878_s0 + $0x58] sm:$0xff]  ;;  %v234_v36 = vld [vmem:[%s2879_s1 + $0x50] sm:$0xff] }
  0x18   : > { %328 = vst.msk [vmem:[#allocation2 + $0x8] sm:$0xff] %vm2243_vm2, %v305_v21  ;;  %v273_v33 = vadd.f32 %v233_v30, %v193_v28  ;;  %v307_v37 = vpack.c.bf16 %v271_v27, %v270_v26  ;;  %v235_v38 = vld [vmem:[%s2879_s1 + $0x58] sm:$0xff]  ;;  %v274_v39 = vadd.f32 %v234_v36, %v194_v34  ;;  %v196_v40 = vld [vmem:[%s2878_s0 + $0x60] sm:$0xff]  ;;  %v197_v41 = vld [vmem:[%s2878_s0 + $0x68] sm:$0xff] }
  0x19   : > { %329 = vst.msk [vmem:[#allocation2 + $0x10] sm:$0xff] %vm2243_vm2, %v306_v31  ;;  %v275_v43 = vadd.f32 %v235_v38, %v195_v35  ;;  %v236_v44 = vld [vmem:[%s2879_s1 + $0x60] sm:$0xff]  ;;  %v237_v45 = vld [vmem:[%s2879_s1 + $0x68] sm:$0xff]  ;;  %v198_v46 = vld [vmem:[%s2878_s0 + $0x70] sm:$0xff] }
  0x1a   : > { %v308_v42 = vpack.c.bf16 %v273_v33, %v272_v32  ;;  %330 = vst.msk [vmem:[#allocation2 + $0x18] sm:$0xff] %vm2243_vm2, %v307_v37  ;;  %v276_v47 = vadd.f32 %v236_v44, %v196_v40  ;;  %v277_v48 = vadd.f32 %v237_v45, %v197_v41  ;;  %v199_v49 = vld [vmem:[%s2878_s0 + $0x78] sm:$0xff]  ;;  %v238_v50 = vld [vmem:[%s2879_s1 + $0x70] sm:$0xff]  ;;  %v200_v55 = vld [vmem:[%s2878_s0 + $0x80] sm:$0xff] }
  0x1b   : > { %v239_v51 = vld [vmem:[%s2879_s1 + $0x78] sm:$0xff]  ;;  %v309_v52 = vpack.c.bf16 %v275_v43, %v274_v39  ;;  %v278_v53 = vadd.f32 %v238_v50, %v198_v46  ;;  %v201_v56 = vld [vmem:[%s2878_s0 + $0x88] sm:$0xff]  ;;  %v240_v57 = vld [vmem:[%s2879_s1 + $0x80] sm:$0xff] }
  0x1c   : > { %331 = vst.msk [vmem:[#allocation2 + $0x20] sm:$0xff] %vm2243_vm2, %v308_v42  ;;  %v279_v54 = vadd.f32 %v239_v51, %v199_v49  ;;  %v310_v58 = vpack.c.bf16 %v277_v48, %v276_v47  ;;  %v241_v59 = vld [vmem:[%s2879_s1 + $0x88] sm:$0xff]  ;;  %v280_v60 = vadd.f32 %v240_v57, %v200_v55  ;;  %v202_v61 = vld [vmem:[%s2878_s0 + $0x90] sm:$0xff]  ;;  %v203_v62 = vld [vmem:[%s2878_s0 + $0x98] sm:$0xff] }
  0x1d   : > { %332 = vst.msk [vmem:[#allocation2 + $0x28] sm:$0xff] %vm2243_vm2, %v309_v52  ;;  %v281_v0 = vadd.f32 %v241_v59, %v201_v56  ;;  %v242_v1 = vld [vmem:[%s2879_s1 + $0x90] sm:$0xff]  ;;  %v243_v2 = vld [vmem:[%s2879_s1 + $0x98] sm:$0xff]  ;;  %v204_v3 = vld [vmem:[%s2878_s0 + $0xa0] sm:$0xff] }
  0x1e   : > { %v311_v63 = vpack.c.bf16 %v279_v54, %v278_v53  ;;  %333 = vst.msk [vmem:[#allocation2 + $0x30] sm:$0xff] %vm2243_vm2, %v310_v58  ;;  %v282_v4 = vadd.f32 %v242_v1, %v202_v61  ;;  %v283_v6 = vadd.f32 %v243_v2, %v203_v62  ;;  %v205_v7 = vld [vmem:[%s2878_s0 + $0xa8] sm:$0xff]  ;;  %v244_v8 = vld [vmem:[%s2879_s1 + $0xa0] sm:$0xff]  ;;  %v206_v13 = vld [vmem:[%s2878_s0 + $0xb0] sm:$0xff] }
  0x1f   : > { %v245_v9 = vld [vmem:[%s2879_s1 + $0xa8] sm:$0xff]  ;;  %v312_v10 = vpack.c.bf16 %v281_v0, %v280_v60  ;;  %v284_v11 = vadd.f32 %v244_v8, %v204_v3  ;;  %v207_v14 = vld [vmem:[%s2878_s0 + $0xb8] sm:$0xff]  ;;  %v246_v15 = vld [vmem:[%s2879_s1 + $0xb0] sm:$0xff] }
  0x20   : > { %334 = vst.msk [vmem:[#allocation2 + $0x38] sm:$0xff] %vm2243_vm2, %v311_v63  ;;  %v285_v12 = vadd.f32 %v245_v9, %v205_v7  ;;  %v313_v16 = vpack.c.bf16 %v283_v6, %v282_v4  ;;  %v247_v17 = vld [vmem:[%s2879_s1 + $0xb8] sm:$0xff]  ;;  %v286_v18 = vadd.f32 %v246_v15, %v206_v13  ;;  %v208_v19 = vld [vmem:[%s2878_s0 + $0xc0] sm:$0xff]  ;;  %v209_v20 = vld [vmem:[%s2878_s0 + $0xc8] sm:$0xff] }
  0x21   : > { %335 = vst.msk [vmem:[#allocation2 + $0x40] sm:$0xff] %vm2243_vm2, %v312_v10  ;;  %v287_v22 = vadd.f32 %v247_v17, %v207_v14  ;;  %v248_v23 = vld [vmem:[%s2879_s1 + $0xc0] sm:$0xff]  ;;  %v249_v24 = vld [vmem:[%s2879_s1 + $0xc8] sm:$0xff]  ;;  %v210_v25 = vld [vmem:[%s2878_s0 + $0xd0] sm:$0xff] }
  0x22   : > { %v314_v21 = vpack.c.bf16 %v285_v12, %v284_v11  ;;  %336 = vst.msk [vmem:[#allocation2 + $0x48] sm:$0xff] %vm2243_vm2, %v313_v16  ;;  %v288_v26 = vadd.f32 %v248_v23, %v208_v19  ;;  %v289_v27 = vadd.f32 %v249_v24, %v209_v20  ;;  %v211_v28 = vld [vmem:[%s2878_s0 + $0xd8] sm:$0xff]  ;;  %v250_v29 = vld [vmem:[%s2879_s1 + $0xd0] sm:$0xff]  ;;  %v212_v34 = vld [vmem:[%s2878_s0 + $0xe0] sm:$0xff] }
  0x23   : > { %v251_v30 = vld [vmem:[%s2879_s1 + $0xd8] sm:$0xff]  ;;  %v315_v31 = vpack.c.bf16 %v287_v22, %v286_v18  ;;  %v290_v32 = vadd.f32 %v250_v29, %v210_v25  ;;  %v213_v35 = vld [vmem:[%s2878_s0 + $0xe8] sm:$0xff]  ;;  %v252_v36 = vld [vmem:[%s2879_s1 + $0xe0] sm:$0xff] }
  0x24   : > { %337 = vst.msk [vmem:[#allocation2 + $0x50] sm:$0xff] %vm2243_vm2, %v314_v21  ;;  %v291_v33 = vadd.f32 %v251_v30, %v211_v28  ;;  %v316_v37 = vpack.c.bf16 %v289_v27, %v288_v26  ;;  %v253_v38 = vld [vmem:[%s2879_s1 + $0xe8] sm:$0xff]  ;;  %v292_v39 = vadd.f32 %v252_v36, %v212_v34  ;;  %v214_v40 = vld [vmem:[%s2878_s0 + $0xf0] sm:$0xff]  ;;  %v215_v41 = vld [vmem:[%s2878_s0 + $0xf8] sm:$0xff] }
  0x25   : > { %338 = vst.msk [vmem:[#allocation2 + $0x58] sm:$0xff] %vm2243_vm2, %v315_v31  ;;  %v293_v43 = vadd.f32 %v253_v38, %v213_v35  ;;  %v254_v44 = vld [vmem:[%s2879_s1 + $0xf0] sm:$0xff]  ;;  %v255_v45 = vld [vmem:[%s2879_s1 + $0xf8] sm:$0xff]  ;;  %v216_v46 = vld [vmem:[%s2878_s0 + $0x100] sm:$0xff] }
  0x26   : > { %v317_v42 = vpack.c.bf16 %v291_v33, %v290_v32  ;;  %339 = vst.msk [vmem:[#allocation2 + $0x60] sm:$0xff] %vm2243_vm2, %v316_v37  ;;  %v294_v47 = vadd.f32 %v254_v44, %v214_v40  ;;  %v295_v48 = vadd.f32 %v255_v45, %v215_v41  ;;  %v217_v49 = vld [vmem:[%s2878_s0 + $0x108] sm:$0xff]  ;;  %v256_v50 = vld [vmem:[%s2879_s1 + $0x100] sm:$0xff]  ;;  %v218_v55 = vld [vmem:[%s2878_s0 + $0x110] sm:$0xff] }
  0x27   : > { %v257_v51 = vld [vmem:[%s2879_s1 + $0x108] sm:$0xff]  ;;  %v318_v52 = vpack.c.bf16 %v293_v43, %v292_v39  ;;  %v296_v53 = vadd.f32 %v256_v50, %v216_v46  ;;  %v219_v56 = vld [vmem:[%s2878_s0 + $0x118] sm:$0xff]  ;;  %v258_v57 = vld [vmem:[%s2879_s1 + $0x110] sm:$0xff] }
  0x28   : > { %340 = vst.msk [vmem:[#allocation2 + $0x68] sm:$0xff] %vm2243_vm2, %v317_v42  ;;  %v297_v54 = vadd.f32 %v257_v51, %v217_v49  ;;  %v319_v58 = vpack.c.bf16 %v295_v48, %v294_v47  ;;  %v259_v59 = vld [vmem:[%s2879_s1 + $0x118] sm:$0xff]  ;;  %v298_v60 = vadd.f32 %v258_v57, %v218_v55  ;;  %v220_v61 = vld [vmem:[%s2878_s0 + $0x120] sm:$0xff]  ;;  %v221_v62 = vld [vmem:[%s2878_s0 + $0x128] sm:$0xff] }
  0x29   : > { %341 = vst.msk [vmem:[#allocation2 + $0x70] sm:$0xff] %vm2243_vm2, %v318_v52  ;;  %v299_v0 = vadd.f32 %v259_v59, %v219_v56  ;;  %v260_v1 = vld [vmem:[%s2879_s1 + $0x120] sm:$0xff]  ;;  %v261_v2 = vld [vmem:[%s2879_s1 + $0x128] sm:$0xff]  ;;  %v222_v3 = vld [vmem:[%s2878_s0 + $0x130] sm:$0xff] }
  0x2a   : > { %v320_v63 = vpack.c.bf16 %v297_v54, %v296_v53  ;;  %342 = vst.msk [vmem:[#allocation2 + $0x78] sm:$0xff] %vm2243_vm2, %v319_v58  ;;  %v300_v4 = vadd.f32 %v260_v1, %v220_v61  ;;  %v301_v6 = vadd.f32 %v261_v2, %v221_v62  ;;  %v223_v7 = vld [vmem:[%s2878_s0 + $0x138] sm:$0xff]  ;;  %v262_v8 = vld [vmem:[%s2879_s1 + $0x130] sm:$0xff] }
  0x2b   : > { %v263_v9 = vld [vmem:[%s2879_s1 + $0x138] sm:$0xff]  ;;  %v321_v10 = vpack.c.bf16 %v299_v0, %v298_v60  ;;  %v302_v11 = vadd.f32 %v262_v8, %v222_v3 }
  0x2c   : > { %343 = vst.msk [vmem:[#allocation2 + $0x80] sm:$0xff] %vm2243_vm2, %v320_v63  ;;  %v303_v12 = vadd.f32 %v263_v9, %v223_v7  ;;  %v322_v13 = vpack.c.bf16 %v301_v6, %v300_v4 }
  0x2d   : > { %344 = vst.msk [vmem:[#allocation2 + $0x88] sm:$0xff] %vm2243_vm2, %v321_v10 }
  0x2e   : > { %v323_v14 = vpack.c.bf16 %v303_v12, %v302_v11  ;;  %345 = vst.msk [vmem:[#allocation2 + $0x90] sm:$0xff] %vm2243_vm2, %v322_v13 }
  0x30   : > { %346 = vst.msk [vmem:[#allocation2 + $0x98] sm:$0xff] %vm2243_vm2, %v323_v14 }
  0x31 PF: > { %v2011_v15 = vld [vmem:[#allocation2 + $0x70] sm:$0xf]  ;;  %v2112_v16 = vld [vmem:[#allocation2 + $0x74] sm:$0xf0]  ;;  %v2111_v17 = vld [vmem:[#allocation2 + $0x74] sm:$0xf] }
  0x32   : > { %v2012_v18 = vor.u32 %v2112_v16, %v2011_v15  ;;  %v2013_v19 = vld [vmem:[#allocation2 + $0x78] sm:$0xf0]  ;;  %v2003_v20 = vld [vmem:[#allocation2 + $0x60] sm:$0xf]  ;;  %v2110_v21 = vld [vmem:[#allocation2 + $0x64] sm:$0xf0] }
  0x33   : > { %v2016_v22 = vor.u32 %v2111_v17, %v2013_v19  ;;  %v2109_v23 = vld [vmem:[#allocation2 + $0x64] sm:$0xf]  ;;  %v2005_v24 = vld [vmem:[#allocation2 + $0x68] sm:$0xf0]  ;;  %v2004_v25 = vor.u32 %v2110_v21, %v2003_v20  ;;  %v1995_v27 = vld [vmem:[#allocation2 + $0x50] sm:$0xf] }
  0x34   : > { %888 = vmatpush.bf16.msra.mxu0 %v2012_v18  ;;  %v2008_v26 = vor.u32 %v2109_v23, %v2005_v24  ;;  %v2108_v28 = vld [vmem:[#allocation2 + $0x54] sm:$0xf0]  ;;  %v2107_v29 = vld [vmem:[#allocation2 + $0x54] sm:$0xf]  ;;  %v1997_v5 = vld [vmem:[#allocation2 + $0x58] sm:$0xf0] }
  0x35   : > { %1206 = vmatpush.bf16.msra.mxu2 %v2016_v22  ;;  %v2115_v30 = vld [vmem:[#allocation2 + $0x94] sm:$0xf]  ;;  %v1996_v31 = vor.u32 %v2108_v28, %v1995_v27  ;;  %v1987_v32 = vld [vmem:[#allocation2 + $0x40] sm:$0xf]  ;;  %v2106_v33 = vld [vmem:[#allocation2 + $0x44] sm:$0xf0]  ;;  %v2000_v35 = vor.u32 %v2107_v29, %v1997_v5 }
  0x36   : > { %v2105_v36 = vld [vmem:[#allocation2 + $0x44] sm:$0xf]  ;;  %v1989_v37 = vld [vmem:[#allocation2 + $0x48] sm:$0xf0]  ;;  %v2027_v41 = vld [vmem:[#allocation2 + $0x90] sm:$0xf]  ;;  %v1988_v47 = vor.u32 %v2106_v33, %v1987_v32 }
  0x37   : > { %v2029_v34 = vld [vmem:[#allocation2 + $0x98] sm:$0xf0]  ;;  %v2113_v39 = vld [vmem:[#allocation2 + $0x84] sm:$0xf]  ;;  %v2021_v40 = vld [vmem:[#allocation2 + $0x88] sm:$0xf0]  ;;  %v1992_v49 = vor.u32 %v2105_v36, %v1989_v37 }
  0x38   : > { %889 = vmatpush.bf16.msra.mxu0 %v2004_v25  ;;  %v2032_v38 = vor.u32 %v2115_v30, %v2029_v34  ;;  %v2116_v42 = vld [vmem:[#allocation2 + $0x94] sm:$0xf0]  ;;  %v2024_v43 = vor.u32 %v2113_v39, %v2021_v40  ;;  %v2117_v45 = vld [vmem:[%s2224_s19 + $0x4] sm:$0xf]  ;;  %v1717_v46 = vld [vmem:[%s2224_s19 + $0x8] sm:$0xf0] }
  0x39   : > { %1207 = vmatpush.bf16.msra.mxu2 %v2008_v26  ;;  %v2028_v44 = vor.u32 %v2116_v42, %v2027_v41  ;;  %v1979_v48 = vld [vmem:[#allocation2 + $0x30] sm:$0xf]  ;;  %v2104_v50 = vld [vmem:[#allocation2 + $0x34] sm:$0xf0]  ;;  %v2019_v51 = vld [vmem:[#allocation2 + $0x80] sm:$0xf]  ;;  %v1720_v55 = vor.u32 %v2117_v45, %v1717_v46 }
  0x3a   : > { %1371 = vmatpush.bf16.msra.mxu3 %v2032_v38  ;;  %v2114_v52 = vld [vmem:[#allocation2 + $0x84] sm:$0xf0]  ;;  %v2103_v53 = vld [vmem:[#allocation2 + $0x34] sm:$0xf]  ;;  %v1981_v54 = vld [vmem:[#allocation2 + $0x38] sm:$0xf0]  ;;  %v1980_v57 = vor.u32 %v2104_v50, %v1979_v48 }
  0x3b   : > { %1053 = vmatpush.bf16.msra.mxu1 %v2028_v44  ;;  %v2020_v56 = vor.u32 %v2114_v52, %v2019_v51  ;;  %vm797_vm3 = vcmask 261120   ;;  %v1984_v58 = vor.u32 %v2103_v53, %v1981_v54  ;;  %v1971_v59 = vld [vmem:[#allocation2 + $0x20] sm:$0xf]  ;;  %v2102_v60 = vld [vmem:[#allocation2 + $0x24] sm:$0xf0]  ;;  %vm1525_vm4 = vcmask 556032  }
  0x3c   : > { %890 = vmatpush.bf16.msra.mxu0 %v1996_v31  ;;  %v2101_v61 = vld [vmem:[#allocation2 + $0x24] sm:$0xf]  ;;  %v1973_v62 = vld [vmem:[#allocation2 + $0x28] sm:$0xf0]  ;;  %v1972_v63 = vor.u32 %v2102_v60, %v1971_v59  ;;  %v1963_v1 = vld [vmem:[#allocation2 + $0x10] sm:$0xf] }
  0x3d   : > { %1208 = vmatpush.bf16.msra.mxu2 %v2000_v35  ;;  %v1976_v0 = vor.u32 %v2101_v61, %v1973_v62  ;;  %v2100_v2 = vld [vmem:[#allocation2 + $0x14] sm:$0xf0]  ;;  %v2099_v3 = vld [vmem:[#allocation2 + $0x14] sm:$0xf]  ;;  %v1965_v4 = vld [vmem:[#allocation2 + $0x18] sm:$0xf0] }
  0x3e   : > { %1372 = vmatpush.bf16.msra.mxu3 %v2024_v43  ;;  %v1964_v6 = vor.u32 %v2100_v2, %v1963_v1  ;;  %v1968_v7 = vor.u32 %v2099_v3, %v1965_v4  ;;  %v1955_v8 = vld [vmem:[#allocation2] sm:$0xf]  ;;  %v2098_v9 = vld [vmem:[#allocation2 + $0x4] sm:$0xf0]  ;;  %v2097_v10 = vld [vmem:[#allocation2 + $0x4] sm:$0xf] }
  0x3f   : > { %1054 = vmatpush.bf16.msra.mxu1 %v2020_v56  ;;  %v1957_v11 = vld [vmem:[#allocation2 + $0x8] sm:$0xf0]  ;;  %v2119_v12 = vld [vmem:[%s2224_s19 + $0x14] sm:$0xf]  ;;  %v1725_v13 = vld [vmem:[%s2224_s19 + $0x18] sm:$0xf0]  ;;  %v1956_v14 = vor.u32 %v2098_v9, %v1955_v8 }
  0x40   : > { %891 = vmatpush.bf16.msra.mxu0 %v1988_v47  ;;  %v1715_v15 = vld [vmem:[%s2224_s19] sm:$0xf]  ;;  %v2118_v16 = vld [vmem:[%s2224_s19 + $0x4] sm:$0xf0]  ;;  %v1960_v17 = vor.u32 %v2097_v10, %v1957_v11  ;;  %v1728_v18 = vor.u32 %v2119_v12, %v1725_v13  ;;  %v2121_v20 = vld [vmem:[%s2224_s19 + $0x24] sm:$0xf] }
  0x41   : > { %1209 = vmatpush.bf16.msra.mxu2 %v1992_v49  ;;  %2063 = vmatmul.msk.bf16.vlgmr.msra.gmra.mxu3 %vm797_vm3, %v1720_v55  ;;  %v1716_v19 = vor.u32 %v2118_v16, %v1715_v15  ;;  %v1733_v21 = vld [vmem:[%s2224_s19 + $0x28] sm:$0xf0]  ;;  %v1723_v22 = vld [vmem:[%s2224_s19 + $0x10] sm:$0xf]  ;;  %v2120_v23 = vld [vmem:[%s2224_s19 + $0x14] sm:$0xf0] }
  0x42   : > { %2033 = vmatmul.msk.bf16.vlgmr.msra.gmra.mxu1 %vm797_vm3, %v1720_v55  ;;  %v1736_v24 = vor.u32 %v2121_v20, %v1733_v21  ;;  %v1724_v25 = vor.u32 %v2120_v23, %v1723_v22  ;;  %v2123_v26 = vld [vmem:[%s2224_s19 + $0x34] sm:$0xf]  ;;  %v1741_v27 = vld [vmem:[%s2224_s19 + $0x38] sm:$0xf0]  ;;  %v1731_v28 = vld [vmem:[%s2224_s19 + $0x20] sm:$0xf] }
  0x43   : > { %v2122_v29 = vld [vmem:[%s2224_s19 + $0x24] sm:$0xf0]  ;;  %v1744_v5 = vor.u32 %v2123_v26, %v1741_v27  ;;  %v2125_v31 = vld [vmem:[%s2224_s19 + $0x44] sm:$0xf]  ;;  %v1749_v32 = vld [vmem:[%s2224_s19 + $0x48] sm:$0xf0] }
  0x44   : > { %892 = vmatpush.bf16.msra.mxu0 %v1980_v57  ;;  %v1732_v30 = vor.u32 %v2122_v29, %v1731_v28  ;;  %v1739_v33 = vld [vmem:[%s2224_s19 + $0x30] sm:$0xf]  ;;  %v2124_v34 = vld [vmem:[%s2224_s19 + $0x34] sm:$0xf0]  ;;  %v1752_v35 = vor.u32 %v2125_v31, %v1749_v32  ;;  %v2127_v37 = vld [vmem:[%s2224_s19 + $0x54] sm:$0xf] }
  0x45   : > { %1210 = vmatpush.bf16.msra.mxu2 %v1984_v58  ;;  %v1740_v36 = vor.u32 %v2124_v34, %v1739_v33  ;;  %v1757_v38 = vld [vmem:[%s2224_s19 + $0x58] sm:$0xf0]  ;;  %v1747_v39 = vld [vmem:[%s2224_s19 + $0x40] sm:$0xf]  ;;  %v2126_v40 = vld [vmem:[%s2224_s19 + $0x44] sm:$0xf0] }
  0x46   : > { %v1760_v41 = vor.u32 %v2127_v37, %v1757_v38  ;;  %v1748_v42 = vor.u32 %v2126_v40, %v1747_v39  ;;  %v2129_v43 = vld [vmem:[%s2224_s19 + $0x64] sm:$0xf]  ;;  %v1765_v44 = vld [vmem:[%s2224_s19 + $0x68] sm:$0xf0]  ;;  %v1755_v45 = vld [vmem:[%s2224_s19 + $0x50] sm:$0xf] }
  0x47   : > { %v2128_v46 = vld [vmem:[%s2224_s19 + $0x54] sm:$0xf0]  ;;  %v1768_v47 = vor.u32 %v2129_v43, %v1765_v44  ;;  %v2131_v49 = vld [vmem:[%s2224_s19 + $0x74] sm:$0xf]  ;;  %v1773_v50 = vld [vmem:[%s2224_s19 + $0x78] sm:$0xf0] }
  0x48   : > { %893 = vmatpush.bf16.msra.mxu0 %v1972_v63  ;;  %v1756_v48 = vor.u32 %v2128_v46, %v1755_v45  ;;  %v1763_v51 = vld [vmem:[%s2224_s19 + $0x60] sm:$0xf]  ;;  %v2130_v52 = vld [vmem:[%s2224_s19 + $0x64] sm:$0xf0]  ;;  %v1776_v53 = vor.u32 %v2131_v49, %v1773_v50  ;;  %v2133_v55 = vld [vmem:[%s2224_s19 + $0x84] sm:$0xf] }
  0x49   : > { %1211 = vmatpush.bf16.msra.mxu2 %v1976_v0  ;;  %v1764_v54 = vor.u32 %v2130_v52, %v1763_v51  ;;  %v1781_v56 = vld [vmem:[%s2224_s19 + $0x88] sm:$0xf0]  ;;  %v1771_v57 = vld [vmem:[%s2224_s19 + $0x70] sm:$0xf]  ;;  %v2132_v58 = vld [vmem:[%s2224_s19 + $0x74] sm:$0xf0] }
  0x4a   : > { %v1784_v59 = vor.u32 %v2133_v55, %v1781_v56  ;;  %v1772_v60 = vor.u32 %v2132_v58, %v1771_v57  ;;  %v2135_v0 = vld [vmem:[%s2224_s19 + $0x94] sm:$0xf]  ;;  %v1789_v1 = vld [vmem:[%s2224_s19 + $0x98] sm:$0xf0]  ;;  %v1779_v2 = vld [vmem:[%s2224_s19 + $0x80] sm:$0xf] }
  0x4b   : > { %v2134_v3 = vld [vmem:[%s2224_s19 + $0x84] sm:$0xf0]  ;;  %v2136_v20 = vld [vmem:[%s2224_s19 + $0x94] sm:$0xf0]  ;;  %v2139_v34 = vld [vmem:[%s2224_s19 + $0xb4] sm:$0xf] }
  0x4c   : > { %894 = vmatpush.bf16.msra.mxu0 %v1964_v6  ;;  %v1792_v6 = vor.u32 %v2135_v0, %v1789_v1  ;;  %v2138_v37 = vld [vmem:[%s2224_s19 + $0xa4] sm:$0xf0]  ;;  %v2141_v52 = vld [vmem:[%s2224_s19 + $0xc4] sm:$0xf]  ;;  %v2140_v55 = vld [vmem:[%s2224_s19 + $0xb4] sm:$0xf0] }
  0x4d   : > { %1212 = vmatpush.bf16.msra.mxu2 %v1968_v7  ;;  %v1780_v7 = vor.u32 %v2134_v3, %v1779_v2 }
  0x50   : > { %895 = vmatpush.bf16.msra.mxu0 %v1956_v14 }
  0x51   : > { %1213 = vmatpush.bf16.msra.mxu2 %v1960_v17  ;;  %2064 = vmatmul.msk.bf16.gmra.mxu3 %vm797_vm3, %v1728_v18  ;;  %v2137_v17 = vld [vmem:[%s2224_s19 + $0xa4] sm:$0xf] }
  0x52   : > { %2034 = vmatmul.msk.bf16.gmra.mxu1 %vm797_vm3, %v1728_v18  ;;  %v1797_v18 = vld [vmem:[%s2224_s19 + $0xa8] sm:$0xf0] }
  0x53   : > { %896 = vmatmul.bf16.vlgmr.msra.gmra.mxu0 %v1716_v19  ;;  %v1800_v22 = vor.u32 %v2137_v17, %v1797_v18 }
  0x54   : > { %1214 = vmatmul.bf16.vlgmr.msra.gmra.mxu2 %v1716_v19  ;;  %v1787_v19 = vld [vmem:[%s2224_s19 + $0x90] sm:$0xf] }
  0x61   : > { %2065 = vmatmul.msk.bf16.gmra.mxu3 %vm797_vm3, %v1736_v24 }
  0x62   : > { %2035 = vmatmul.msk.bf16.gmra.mxu1 %vm797_vm3, %v1736_v24  ;;  %v1788_v24 = vor.u32 %v2136_v20, %v1787_v19 }
  0x63   : > { %901 = vmatmul.bf16.gmra.mxu0 %v1724_v25 }
  0x64   : > { %1219 = vmatmul.bf16.gmra.mxu2 %v1724_v25 }
  0x71   : > { %2066 = vmatmul.msk.bf16.gmra.mxu3 %vm797_vm3, %v1744_v5 }
  0x72   : > { %2036 = vmatmul.msk.bf16.gmra.mxu1 %vm797_vm3, %v1744_v5 }
  0x73   : > { %906 = vmatmul.bf16.gmra.mxu0 %v1732_v30 }
  0x74   : > { %1224 = vmatmul.bf16.gmra.mxu2 %v1732_v30 }
  0x81   : > { %2067 = vmatmul.msk.bf16.gmra.mxu3 %vm797_vm3, %v1752_v35 }
  0x82   : > { %2037 = vmatmul.msk.bf16.gmra.mxu1 %vm797_vm3, %v1752_v35  ;;  %v1805_v35 = vld [vmem:[%s2224_s19 + $0xb8] sm:$0xf0] }
  0x83   : > { %911 = vmatmul.bf16.gmra.mxu0 %v1740_v36  ;;  %v1808_v39 = vor.u32 %v2139_v34, %v1805_v35 }
  0x84   : > { %1229 = vmatmul.bf16.gmra.mxu2 %v1740_v36  ;;  %v1795_v36 = vld [vmem:[%s2224_s19 + $0xa0] sm:$0xf] }
  0x91   : > { %2068 = vmatmul.msk.bf16.gmra.mxu3 %vm797_vm3, %v1760_v41 }
  0x92   : > { %2038 = vmatmul.msk.bf16.gmra.mxu1 %vm797_vm3, %v1760_v41  ;;  %v1796_v41 = vor.u32 %v2138_v37, %v1795_v36 }
  0x93   : > { %916 = vmatmul.bf16.gmra.mxu0 %v1748_v42 }
  0x94   : > { %1234 = vmatmul.bf16.gmra.mxu2 %v1748_v42 }
  0xa1   : > { %2069 = vmatmul.msk.bf16.gmra.mxu3 %vm797_vm3, %v1768_v47 }
  0xa2   : > { %2039 = vmatmul.msk.bf16.gmra.mxu1 %vm797_vm3, %v1768_v47 }
  0xa3   : > { %921 = vmatmul.bf16.gmra.mxu0 %v1756_v48 }
  0xa4   : > { %1239 = vmatmul.bf16.gmra.mxu2 %v1756_v48 }
  0xb1   : > { %2070 = vmatmul.msk.bf16.gmra.mxu3 %vm797_vm3, %v1776_v53 }
  0xb2   : > { %2040 = vmatmul.msk.bf16.gmra.mxu1 %vm797_vm3, %v1776_v53  ;;  %v1813_v53 = vld [vmem:[%s2224_s19 + $0xc8] sm:$0xf0] }
  0xb3   : > { %926 = vmatmul.bf16.gmra.mxu0 %v1764_v54  ;;  %v1816_v57 = vor.u32 %v2141_v52, %v1813_v53 }
  0xb4   : > { %1244 = vmatmul.bf16.gmra.mxu2 %v1764_v54  ;;  %v1803_v54 = vld [vmem:[%s2224_s19 + $0xb0] sm:$0xf] }
  0xbf   : > { %v1056_v61 = vpop.f32.mrf.mxu1 }
  0xc1   : > { %2071 = vmatmul.msk.bf16.gmra.mxu3 %vm797_vm3, %v1784_v59 }
  0xc2   : > { %2041 = vmatmul.msk.bf16.gmra.mxu1 %vm797_vm3, %v1784_v59  ;;  %v1804_v59 = vor.u32 %v2140_v55, %v1803_v54 }
  0xc3   : > { %931 = vmatmul.bf16.gmra.mxu0 %v1772_v60 }
  0xc4   : > { %1249 = vmatmul.bf16.gmra.mxu2 %v1772_v60  ;;  %v1374_v62 = vpop.f32.mrf.mxu3 }
  0xc7   : > { %v1058_v63 = vpop.f32.mrf.mxu1 }
  0xcc   : > { %v1376_v4 = vpop.f32.mrf.mxu3 }
  0xcf   : > { %v1061_v10 = vpop.f32.mrf.mxu1 }
  0xd0   : > { %v897_v8 = vpop.f32.mrf.mxu0 }
  0xd1   : > { %v1057_v9 = vadd.f32 %v1056_v61, %v897_v8  ;;  %2072 = vmatmul.msk.bf16.gmra.mxu3 %vm797_vm3, %v1792_v6  ;;  %v1821_v8 = vld [vmem:[%s2224_s19 + $0xd8] sm:$0xf0] }
  0xd2   : > { %2042 = vmatmul.msk.bf16.gmra.mxu1 %vm797_vm3, %v1792_v6 }
  0xd3   : > { %1524 = vst [vmem:[%s2229_s22] sm:$0xff] %v1057_v9  ;;  %936 = vmatmul.bf16.gmra.mxu0 %v1780_v7  ;;  %v1811_v9 = vld [vmem:[%s2224_s19 + $0xc0] sm:$0xf] }
  0xd4   : > { %1254 = vmatmul.bf16.gmra.mxu2 %v1780_v7  ;;  %v1379_v11 = vpop.f32.mrf.mxu3  ;;  %v2143_v7 = vld [vmem:[%s2224_s19 + $0xd4] sm:$0xf] }
  0xd7   : > { %v1215_v12 = vpop.f32.mrf.mxu2  ;;  %v1063_v16 = vpop.f32.mrf.mxu1 }
  0xd8   : > { %v1375_v13 = vadd.f32 %v1374_v62, %v1215_v12  ;;  %v899_v14 = vpop.f32.mrf.mxu0  ;;  %v1824_v12 = vor.u32 %v2143_v7, %v1821_v8 }
  0xd9   : > { %v1059_v15 = vadd.f32 %v1058_v63, %v899_v14 }
  0xda   : > { %1526 = vst.msk [vmem:[%s2229_s22 + $0x8] sm:$0xff] %vm1525_vm4, %v1375_v13 }
  0xdb   : > { %1527 = vst [vmem:[%s2229_s22 + $0x10] sm:$0xff] %v1059_v15 }
  0xdc   : > { %v1381_v21 = vpop.f32.mrf.mxu3 }
  0xdf   : > { %v1217_v23 = vpop.f32.mrf.mxu2  ;;  %v1066_v28 = vpop.f32.mrf.mxu1 }
  0xe0   : > { %v1377_v25 = vadd.f32 %v1376_v4, %v1217_v23  ;;  %v902_v26 = vpop.f32.mrf.mxu0 }
  0xe1   : > { %v1062_v27 = vadd.f32 %v1061_v10, %v902_v26  ;;  %2073 = vmatmul.msk.bf16.gmra.mxu3 %vm797_vm3, %v1800_v22  ;;  %v2142_v10 = vld [vmem:[%s2224_s19 + $0xc4] sm:$0xf0]  ;;  %v1829_v26 = vld [vmem:[%s2224_s19 + $0xe8] sm:$0xf0] }
  0xe2   : > { %1528 = vst.msk [vmem:[%s2229_s22 + $0x18] sm:$0xff] %vm1525_vm4, %v1377_v25  ;;  %2043 = vmatmul.msk.bf16.gmra.mxu1 %vm797_vm3, %v1800_v22  ;;  %v1812_v14 = vor.u32 %v2142_v10, %v1811_v9  ;;  %v2145_v25 = vld [vmem:[%s2224_s19 + $0xe4] sm:$0xf] }
  0xe3   : > { %1529 = vst [vmem:[%s2229_s22 + $0x20] sm:$0xff] %v1062_v27  ;;  %941 = vmatmul.bf16.gmra.mxu0 %v1788_v24  ;;  %v1819_v27 = vld [vmem:[%s2224_s19 + $0xd0] sm:$0xf] }
  0xe4   : > { %1259 = vmatmul.bf16.gmra.mxu2 %v1788_v24  ;;  %v1384_v29 = vpop.f32.mrf.mxu3 }
  0xe7   : > { %v1220_v5 = vpop.f32.mrf.mxu2  ;;  %v1068_v33 = vpop.f32.mrf.mxu1 }
  0xe8   : > { %v1380_v30 = vadd.f32 %v1379_v11, %v1220_v5  ;;  %v904_v31 = vpop.f32.mrf.mxu0  ;;  %v1832_v5 = vor.u32 %v2145_v25, %v1829_v26 }
  0xe9   : > { %v1064_v32 = vadd.f32 %v1063_v16, %v904_v31 }
  0xea   : > { %1530 = vst.msk [vmem:[%s2229_s22 + $0x28] sm:$0xff] %vm1525_vm4, %v1380_v30 }
  0xeb   : > { %1531 = vst [vmem:[%s2229_s22 + $0x30] sm:$0xff] %v1064_v32 }
  0xec   : > { %v1386_v38 = vpop.f32.mrf.mxu3 }
  0xef   : > { %v1222_v40 = vpop.f32.mrf.mxu2  ;;  %v1071_v45 = vpop.f32.mrf.mxu1 }
  0xf0   : > { %v1382_v42 = vadd.f32 %v1381_v21, %v1222_v40  ;;  %v907_v43 = vpop.f32.mrf.mxu0 }
  0xf1   : > { %v1067_v44 = vadd.f32 %v1066_v28, %v907_v43  ;;  %2074 = vmatmul.msk.bf16.gmra.mxu3 %vm797_vm3, %v1808_v39  ;;  %v2144_v28 = vld [vmem:[%s2224_s19 + $0xd4] sm:$0xf0]  ;;  %v1837_v43 = vld [vmem:[%s2224_s19 + $0xf8] sm:$0xf0] }
  0xf2   : > { %1532 = vst.msk [vmem:[%s2229_s22 + $0x38] sm:$0xff] %vm1525_vm4, %v1382_v42  ;;  %2044 = vmatmul.msk.bf16.gmra.mxu1 %vm797_vm3, %v1808_v39  ;;  %v1820_v31 = vor.u32 %v2144_v28, %v1819_v27  ;;  %v2147_v42 = vld [vmem:[%s2224_s19 + $0xf4] sm:$0xf] }
  0xf3   : > { %1533 = vst [vmem:[%s2229_s22 + $0x40] sm:$0xff] %v1067_v44  ;;  %946 = vmatmul.bf16.gmra.mxu0 %v1796_v41  ;;  %v1827_v44 = vld [vmem:[%s2224_s19 + $0xe0] sm:$0xf] }
  0xf4   : > { %1264 = vmatmul.bf16.gmra.mxu2 %v1796_v41  ;;  %v1389_v46 = vpop.f32.mrf.mxu3 }
  0xf7   : > { %v1225_v47 = vpop.f32.mrf.mxu2  ;;  %v1073_v51 = vpop.f32.mrf.mxu1 }
  0xf8   : > { %v1385_v48 = vadd.f32 %v1384_v29, %v1225_v47  ;;  %v909_v49 = vpop.f32.mrf.mxu0  ;;  %v1840_v47 = vor.u32 %v2147_v42, %v1837_v43 }
  0xf9   : > { %v1069_v50 = vadd.f32 %v1068_v33, %v909_v49 }
  0xfa   : > { %1534 = vst.msk [vmem:[%s2229_s22 + $0x48] sm:$0xff] %vm1525_vm4, %v1385_v48 }
  0xfb   : > { %1535 = vst [vmem:[%s2229_s22 + $0x50] sm:$0xff] %v1069_v50 }
  0xfc   : > { %v1391_v56 = vpop.f32.mrf.mxu3 }
  0xff   : > { %v1227_v58 = vpop.f32.mrf.mxu2  ;;  %v1076_v63 = vpop.f32.mrf.mxu1 }
 0x100   : > { %v1387_v60 = vadd.f32 %v1386_v38, %v1227_v58  ;;  %v912_v61 = vpop.f32.mrf.mxu0 }
 0x101   : > { %v1072_v62 = vadd.f32 %v1071_v45, %v912_v61  ;;  %2075 = vmatmul.msk.bf16.gmra.mxu3 %vm797_vm3, %v1816_v57  ;;  %v2146_v45 = vld [vmem:[%s2224_s19 + $0xe4] sm:$0xf0]  ;;  %v1845_v61 = vld [vmem:[%s2224_s19 + $0x108] sm:$0xf0] }
 0x102   : > { %1536 = vst.msk [vmem:[%s2229_s22 + $0x58] sm:$0xff] %vm1525_vm4, %v1387_v60  ;;  %2045 = vmatmul.msk.bf16.gmra.mxu1 %vm797_vm3, %v1816_v57  ;;  %v1828_v49 = vor.u32 %v2146_v45, %v1827_v44  ;;  %v2149_v60 = vld [vmem:[%s2224_s19 + $0x104] sm:$0xf] }
 0x103   : > { %1537 = vst [vmem:[%s2229_s22 + $0x60] sm:$0xff] %v1072_v62  ;;  %951 = vmatmul.bf16.gmra.mxu0 %v1804_v59  ;;  %v1835_v62 = vld [vmem:[%s2224_s19 + $0xf0] sm:$0xf] }
 0x104   : > { %1269 = vmatmul.bf16.gmra.mxu2 %v1804_v59  ;;  %v1394_v0 = vpop.f32.mrf.mxu3 }
 0x107   : > { %v1230_v1 = vpop.f32.mrf.mxu2  ;;  %v1078_v6 = vpop.f32.mrf.mxu1 }
 0x108   : > { %v1390_v2 = vadd.f32 %v1389_v46, %v1230_v1  ;;  %v914_v3 = vpop.f32.mrf.mxu0  ;;  %v1848_v1 = vor.u32 %v2149_v60, %v1845_v61 }
 0x109   : > { %v1074_v4 = vadd.f32 %v1073_v51, %v914_v3 }
 0x10a   : > { %1538 = vst.msk [vmem:[%s2229_s22 + $0x68] sm:$0xff] %vm1525_vm4, %v1390_v2 }
 0x10b   : > { %1539 = vst [vmem:[%s2229_s22 + $0x70] sm:$0xff] %v1074_v4 }
 0x10c   : > { %v1396_v11 = vpop.f32.mrf.mxu3 }
 0x10f   : > { %v1232_v13 = vpop.f32.mrf.mxu2  ;;  %v1081_v18 = vpop.f32.mrf.mxu1 }
 0x110   : > { %v1392_v15 = vadd.f32 %v1391_v56, %v1232_v13  ;;  %v917_v16 = vpop.f32.mrf.mxu0 }
 0x111   : > { %v1077_v17 = vadd.f32 %v1076_v63, %v917_v16  ;;  %2076 = vmatmul.msk.bf16.gmra.mxu3 %vm797_vm3, %v1824_v12  ;;  %v2148_v63 = vld [vmem:[%s2224_s19 + $0xf4] sm:$0xf0]  ;;  %v1853_v16 = vld [vmem:[%s2224_s19 + $0x118] sm:$0xf0] }
 0x112   : > { %1540 = vst.msk [vmem:[%s2229_s22 + $0x78] sm:$0xff] %vm1525_vm4, %v1392_v15  ;;  %2046 = vmatmul.msk.bf16.gmra.mxu1 %vm797_vm3, %v1824_v12  ;;  %v1836_v3 = vor.u32 %v2148_v63, %v1835_v62  ;;  %v2151_v15 = vld [vmem:[%s2224_s19 + $0x114] sm:$0xf] }
 0x113   : > { %1541 = vst [vmem:[%s2229_s22 + $0x80] sm:$0xff] %v1077_v17  ;;  %956 = vmatmul.bf16.gmra.mxu0 %v1812_v14  ;;  %v1843_v17 = vld [vmem:[%s2224_s19 + $0x100] sm:$0xf] }
 0x114   : > { %1274 = vmatmul.bf16.gmra.mxu2 %v1812_v14  ;;  %v1399_v19 = vpop.f32.mrf.mxu3 }
 0x117   : > { %v1235_v20 = vpop.f32.mrf.mxu2  ;;  %v1083_v24 = vpop.f32.mrf.mxu1 }
 0x118   : > { %v1395_v21 = vadd.f32 %v1394_v0, %v1235_v20  ;;  %v919_v22 = vpop.f32.mrf.mxu0  ;;  %v1856_v20 = vor.u32 %v2151_v15, %v1853_v16 }
 0x119   : > { %v1079_v23 = vadd.f32 %v1078_v6, %v919_v22 }
 0x11a   : > { %1542 = vst.msk [vmem:[%s2229_s22 + $0x88] sm:$0xff] %vm1525_vm4, %v1395_v21 }
 0x11b   : > { %1543 = vst [vmem:[%s2229_s22 + $0x90] sm:$0xff] %v1079_v23 }
 0x11c   : > { %v1401_v29 = vpop.f32.mrf.mxu3 }
 0x11f   : > { %v1237_v30 = vpop.f32.mrf.mxu2  ;;  %v1086_v35 = vpop.f32.mrf.mxu1 }
 0x120   : > { %v1397_v32 = vadd.f32 %v1396_v11, %v1237_v30  ;;  %v922_v33 = vpop.f32.mrf.mxu0 }
 0x121   : > { %v1082_v34 = vadd.f32 %v1081_v18, %v922_v33  ;;  %2077 = vmatmul.msk.bf16.gmra.mxu3 %vm797_vm3, %v1832_v5  ;;  %v2150_v18 = vld [vmem:[%s2224_s19 + $0x104] sm:$0xf0]  ;;  %v1861_v33 = vld [vmem:[%s2224_s19 + $0x128] sm:$0xf0] }
 0x122   : > { %1544 = vst.msk [vmem:[%s2229_s22 + $0x98] sm:$0xff] %vm1525_vm4, %v1397_v32  ;;  %2047 = vmatmul.msk.bf16.gmra.mxu1 %vm797_vm3, %v1832_v5  ;;  %v1844_v22 = vor.u32 %v2150_v18, %v1843_v17  ;;  %v2153_v32 = vld [vmem:[%s2224_s19 + $0x124] sm:$0xf] }
 0x123   : > { %1545 = vst [vmem:[%s2229_s22 + $0xa0] sm:$0xff] %v1082_v34  ;;  %961 = vmatmul.bf16.gmra.mxu0 %v1820_v31  ;;  %v1851_v34 = vld [vmem:[%s2224_s19 + $0x110] sm:$0xf] }
 0x124   : > { %1279 = vmatmul.bf16.gmra.mxu2 %v1820_v31  ;;  %v1404_v36 = vpop.f32.mrf.mxu3 }
 0x127   : > { %v1240_v37 = vpop.f32.mrf.mxu2  ;;  %v1088_v41 = vpop.f32.mrf.mxu1 }
 0x128   : > { %v1400_v38 = vadd.f32 %v1399_v19, %v1240_v37  ;;  %v924_v39 = vpop.f32.mrf.mxu0  ;;  %v1864_v37 = vor.u32 %v2153_v32, %v1861_v33 }
 0x129   : > { %v1084_v40 = vadd.f32 %v1083_v24, %v924_v39 }
 0x12a   : > { %1546 = vst.msk [vmem:[%s2229_s22 + $0xa8] sm:$0xff] %vm1525_vm4, %v1400_v38 }
 0x12b   : > { %1547 = vst [vmem:[%s2229_s22 + $0xb0] sm:$0xff] %v1084_v40 }
 0x12c   : > { %v1406_v46 = vpop.f32.mrf.mxu3 }
 0x12f   : > { %v1242_v48 = vpop.f32.mrf.mxu2  ;;  %v1091_v53 = vpop.f32.mrf.mxu1 }
 0x130   : > { %v1402_v50 = vadd.f32 %v1401_v29, %v1242_v48  ;;  %v927_v51 = vpop.f32.mrf.mxu0 }
 0x131   : > { %v1087_v52 = vadd.f32 %v1086_v35, %v927_v51  ;;  %2078 = vmatmul.msk.bf16.gmra.mxu3 %vm797_vm3, %v1840_v47  ;;  %v2152_v35 = vld [vmem:[%s2224_s19 + $0x114] sm:$0xf0]  ;;  %v1869_v51 = vld [vmem:[%s2224_s19 + $0x138] sm:$0xf0] }
 0x132   : > { %1548 = vst.msk [vmem:[%s2229_s22 + $0xb8] sm:$0xff] %vm1525_vm4, %v1402_v50  ;;  %2048 = vmatmul.msk.bf16.gmra.mxu1 %vm797_vm3, %v1840_v47  ;;  %v1852_v39 = vor.u32 %v2152_v35, %v1851_v34  ;;  %v2155_v50 = vld [vmem:[%s2224_s19 + $0x134] sm:$0xf] }
 0x133   : > { %1549 = vst [vmem:[%s2229_s22 + $0xc0] sm:$0xff] %v1087_v52  ;;  %966 = vmatmul.bf16.gmra.mxu0 %v1828_v49  ;;  %v1859_v52 = vld [vmem:[%s2224_s19 + $0x120] sm:$0xf] }
 0x134   : > { %1284 = vmatmul.bf16.gmra.mxu2 %v1828_v49  ;;  %v1409_v54 = vpop.f32.mrf.mxu3 }
 0x137   : > { %v1245_v55 = vpop.f32.mrf.mxu2  ;;  %v1093_v59 = vpop.f32.mrf.mxu1 }
 0x138   : > { %v1405_v56 = vadd.f32 %v1404_v36, %v1245_v55  ;;  %v929_v57 = vpop.f32.mrf.mxu0  ;;  %v1872_v55 = vor.u32 %v2155_v50, %v1869_v51 }
 0x139   : > { %v1089_v58 = vadd.f32 %v1088_v41, %v929_v57 }
 0x13a   : > { %1550 = vst.msk [vmem:[%s2229_s22 + $0xc8] sm:$0xff] %vm1525_vm4, %v1405_v56 }
 0x13b   : > { %1551 = vst [vmem:[%s2229_s22 + $0xd0] sm:$0xff] %v1089_v58 }
 0x13c   : > { %v1411_v0 = vpop.f32.mrf.mxu3 }
 0x13f   : > { %v1247_v2 = vpop.f32.mrf.mxu2  ;;  %v1096_v8 = vpop.f32.mrf.mxu1 }
 0x140   : > { %v1407_v4 = vadd.f32 %v1406_v46, %v1247_v2  ;;  %v932_v6 = vpop.f32.mrf.mxu0 }
 0x141   : > { %v1092_v7 = vadd.f32 %v1091_v53, %v932_v6  ;;  %2079 = vmatmul.msk.bf16.gmra.mxu3 %vm797_vm3, %v1848_v1  ;;  %v2154_v53 = vld [vmem:[%s2224_s19 + $0x124] sm:$0xf0]  ;;  %v1877_v6 = vld [vmem:[%s2224_s19 + $0x148] sm:$0xf0] }
 0x142   : > { %1552 = vst.msk [vmem:[%s2229_s22 + $0xd8] sm:$0xff] %vm1525_vm4, %v1407_v4  ;;  %2049 = vmatmul.msk.bf16.gmra.mxu1 %vm797_vm3, %v1848_v1  ;;  %v1860_v57 = vor.u32 %v2154_v53, %v1859_v52  ;;  %v2157_v4 = vld [vmem:[%s2224_s19 + $0x144] sm:$0xf] }
 0x143   : > { %1553 = vst [vmem:[%s2229_s22 + $0xe0] sm:$0xff] %v1092_v7  ;;  %971 = vmatmul.bf16.gmra.mxu0 %v1836_v3  ;;  %v1867_v7 = vld [vmem:[%s2224_s19 + $0x130] sm:$0xf] }
 0x144   : > { %1289 = vmatmul.bf16.gmra.mxu2 %v1836_v3  ;;  %v1414_v9 = vpop.f32.mrf.mxu3 }
 0x147   : > { %v1250_v10 = vpop.f32.mrf.mxu2  ;;  %v1098_v14 = vpop.f32.mrf.mxu1 }
 0x148   : > { %v1410_v11 = vadd.f32 %v1409_v54, %v1250_v10  ;;  %v934_v12 = vpop.f32.mrf.mxu0  ;;  %v1880_v10 = vor.u32 %v2157_v4, %v1877_v6 }
 0x149   : > { %v1094_v13 = vadd.f32 %v1093_v59, %v934_v12 }
 0x14a   : > { %1554 = vst.msk [vmem:[%s2229_s22 + $0xe8] sm:$0xff] %vm1525_vm4, %v1410_v11 }
 0x14b   : > { %1555 = vst [vmem:[%s2229_s22 + $0xf0] sm:$0xff] %v1094_v13 }
 0x14c   : > { %v1416_v19 = vpop.f32.mrf.mxu3 }
 0x14f   : > { %v1252_v21 = vpop.f32.mrf.mxu2  ;;  %v1101_v26 = vpop.f32.mrf.mxu1 }
 0x150   : > { %v1412_v23 = vadd.f32 %v1411_v0, %v1252_v21  ;;  %v937_v24 = vpop.f32.mrf.mxu0 }
 0x151   : > { %v1097_v25 = vadd.f32 %v1096_v8, %v937_v24  ;;  %2080 = vmatmul.msk.bf16.gmra.mxu3 %vm797_vm3, %v1856_v20  ;;  %v2156_v8 = vld [vmem:[%s2224_s19 + $0x134] sm:$0xf0]  ;;  %v1885_v24 = vld [vmem:[%s2224_s19 + $0x158] sm:$0xf0] }
 0x152   : > { %1556 = vst.msk [vmem:[%s2229_s22 + $0xf8] sm:$0xff] %vm1525_vm4, %v1412_v23  ;;  %2050 = vmatmul.msk.bf16.gmra.mxu1 %vm797_vm3, %v1856_v20  ;;  %v1868_v12 = vor.u32 %v2156_v8, %v1867_v7  ;;  %v2159_v23 = vld [vmem:[%s2224_s19 + $0x154] sm:$0xf] }
 0x153   : > { %1557 = vst [vmem:[%s2229_s22 + $0x100] sm:$0xff] %v1097_v25  ;;  %976 = vmatmul.bf16.gmra.mxu0 %v1844_v22  ;;  %v1875_v25 = vld [vmem:[%s2224_s19 + $0x140] sm:$0xf] }
 0x154   : > { %1294 = vmatmul.bf16.gmra.mxu2 %v1844_v22  ;;  %v1419_v27 = vpop.f32.mrf.mxu3 }
 0x157   : > { %v1255_v28 = vpop.f32.mrf.mxu2  ;;  %v1103_v31 = vpop.f32.mrf.mxu1 }
 0x158   : > { %v1415_v29 = vadd.f32 %v1414_v9, %v1255_v28  ;;  %v939_v5 = vpop.f32.mrf.mxu0  ;;  %v1888_v28 = vor.u32 %v2159_v23, %v1885_v24 }
 0x159   : > { %v1099_v30 = vadd.f32 %v1098_v14, %v939_v5 }
 0x15a   : > { %1558 = vst.msk [vmem:[%s2229_s22 + $0x108] sm:$0xff] %vm1525_vm4, %v1415_v29 }
 0x15b   : > { %1559 = vst [vmem:[%s2229_s22 + $0x110] sm:$0xff] %v1099_v30 }
 0x15c   : > { %v1421_v36 = vpop.f32.mrf.mxu3 }
 0x15f   : > { %v1257_v38 = vpop.f32.mrf.mxu2  ;;  %v1106_v43 = vpop.f32.mrf.mxu1 }
 0x160   : > { %v1417_v40 = vadd.f32 %v1416_v19, %v1257_v38  ;;  %v942_v41 = vpop.f32.mrf.mxu0 }
 0x161   : > { %v1102_v42 = vadd.f32 %v1101_v26, %v942_v41  ;;  %2081 = vmatmul.msk.bf16.gmra.mxu3 %vm797_vm3, %v1864_v37  ;;  %v2158_v26 = vld [vmem:[%s2224_s19 + $0x144] sm:$0xf0]  ;;  %v1893_v41 = vld [vmem:[%s2224_s19 + $0x168] sm:$0xf0] }
 0x162   : > { %1560 = vst.msk [vmem:[%s2229_s22 + $0x118] sm:$0xff] %vm1525_vm4, %v1417_v40  ;;  %2051 = vmatmul.msk.bf16.gmra.mxu1 %vm797_vm3, %v1864_v37  ;;  %v1876_v5 = vor.u32 %v2158_v26, %v1875_v25  ;;  %v2161_v40 = vld [vmem:[%s2224_s19 + $0x164] sm:$0xf] }
 0x163   : > { %1561 = vst [vmem:[%s2229_s22 + $0x120] sm:$0xff] %v1102_v42  ;;  %981 = vmatmul.bf16.gmra.mxu0 %v1852_v39  ;;  %v1883_v42 = vld [vmem:[%s2224_s19 + $0x150] sm:$0xf] }
 0x164   : > { %1299 = vmatmul.bf16.gmra.mxu2 %v1852_v39  ;;  %v1424_v44 = vpop.f32.mrf.mxu3 }
 0x167   : > { %v1260_v45 = vpop.f32.mrf.mxu2  ;;  %v1108_v49 = vpop.f32.mrf.mxu1 }
 0x168   : > { %v1420_v46 = vadd.f32 %v1419_v27, %v1260_v45  ;;  %v944_v47 = vpop.f32.mrf.mxu0  ;;  %v1896_v45 = vor.u32 %v2161_v40, %v1893_v41 }
 0x169   : > { %v1104_v48 = vadd.f32 %v1103_v31, %v944_v47 }
 0x16a   : > { %1562 = vst.msk [vmem:[%s2229_s22 + $0x128] sm:$0xff] %vm1525_vm4, %v1420_v46 }
 0x16b   : > { %1563 = vst [vmem:[%s2229_s22 + $0x130] sm:$0xff] %v1104_v48 }
 0x16c   : > { %v1426_v54 = vpop.f32.mrf.mxu3 }
 0x16f   : > { %v1262_v56 = vpop.f32.mrf.mxu2  ;;  %v1111_v61 = vpop.f32.mrf.mxu1 }
 0x170   : > { %v1422_v58 = vadd.f32 %v1421_v36, %v1262_v56  ;;  %v947_v59 = vpop.f32.mrf.mxu0 }
 0x171   : > { %v1107_v60 = vadd.f32 %v1106_v43, %v947_v59  ;;  %2082 = vmatmul.msk.bf16.gmra.mxu3 %vm797_vm3, %v1872_v55  ;;  %v2160_v43 = vld [vmem:[%s2224_s19 + $0x154] sm:$0xf0]  ;;  %v1901_v59 = vld [vmem:[%s2224_s19 + $0x178] sm:$0xf0] }
 0x172   : > { %1564 = vst.msk [vmem:[%s2229_s22 + $0x138] sm:$0xff] %vm1525_vm4, %v1422_v58  ;;  %2052 = vmatmul.msk.bf16.gmra.mxu1 %vm797_vm3, %v1872_v55  ;;  %v1884_v47 = vor.u32 %v2160_v43, %v1883_v42  ;;  %v2163_v58 = vld [vmem:[%s2224_s19 + $0x174] sm:$0xf] }
 0x173   : > { %1565 = vst [vmem:[%s2229_s22 + $0x140] sm:$0xff] %v1107_v60  ;;  %986 = vmatmul.bf16.gmra.mxu0 %v1860_v57  ;;  %v1891_v60 = vld [vmem:[%s2224_s19 + $0x160] sm:$0xf] }
 0x174   : > { %1304 = vmatmul.bf16.gmra.mxu2 %v1860_v57  ;;  %v1429_v62 = vpop.f32.mrf.mxu3 }
 0x177   : > { %v1265_v63 = vpop.f32.mrf.mxu2  ;;  %v1113_v3 = vpop.f32.mrf.mxu1 }
 0x178   : > { %v1425_v0 = vadd.f32 %v1424_v44, %v1265_v63  ;;  %v949_v1 = vpop.f32.mrf.mxu0  ;;  %v1904_v63 = vor.u32 %v2163_v58, %v1901_v59 }
 0x179   : > { %v1109_v2 = vadd.f32 %v1108_v49, %v949_v1 }
 0x17a   : > { %1566 = vst.msk [vmem:[%s2229_s22 + $0x148] sm:$0xff] %vm1525_vm4, %v1425_v0 }
 0x17b   : > { %1567 = vst [vmem:[%s2229_s22 + $0x150] sm:$0xff] %v1109_v2 }
 0x17c   : > { %v1431_v9 = vpop.f32.mrf.mxu3 }
 0x17f   : > { %v1267_v11 = vpop.f32.mrf.mxu2  ;;  %v1116_v16 = vpop.f32.mrf.mxu1 }
 0x180   : > { %v1427_v13 = vadd.f32 %v1426_v54, %v1267_v11  ;;  %v952_v14 = vpop.f32.mrf.mxu0 }
 0x181   : > { %v1112_v15 = vadd.f32 %v1111_v61, %v952_v14  ;;  %2083 = vmatmul.msk.bf16.gmra.mxu3 %vm797_vm3, %v1880_v10  ;;  %v2162_v61 = vld [vmem:[%s2224_s19 + $0x164] sm:$0xf0]  ;;  %v1909_v14 = vld [vmem:[%s2224_s19 + $0x188] sm:$0xf0] }
 0x182   : > { %1568 = vst.msk [vmem:[%s2229_s22 + $0x158] sm:$0xff] %vm1525_vm4, %v1427_v13  ;;  %2053 = vmatmul.msk.bf16.gmra.mxu1 %vm797_vm3, %v1880_v10  ;;  %v1892_v1 = vor.u32 %v2162_v61, %v1891_v60  ;;  %v2165_v13 = vld [vmem:[%s2224_s19 + $0x184] sm:$0xf] }
 0x183   : > { %1569 = vst [vmem:[%s2229_s22 + $0x160] sm:$0xff] %v1112_v15  ;;  %991 = vmatmul.bf16.gmra.mxu0 %v1868_v12  ;;  %v1899_v15 = vld [vmem:[%s2224_s19 + $0x170] sm:$0xf] }
 0x184   : > { %1309 = vmatmul.bf16.gmra.mxu2 %v1868_v12  ;;  %v1434_v17 = vpop.f32.mrf.mxu3 }
 0x187   : > { %v1270_v18 = vpop.f32.mrf.mxu2  ;;  %v1118_v22 = vpop.f32.mrf.mxu1 }
 0x188   : > { %v1430_v19 = vadd.f32 %v1429_v62, %v1270_v18  ;;  %v954_v20 = vpop.f32.mrf.mxu0  ;;  %v1912_v18 = vor.u32 %v2165_v13, %v1909_v14 }
 0x189   : > { %v1114_v21 = vadd.f32 %v1113_v3, %v954_v20 }
 0x18a   : > { %1570 = vst.msk [vmem:[%s2229_s22 + $0x168] sm:$0xff] %vm1525_vm4, %v1430_v19 }
 0x18b   : > { %1571 = vst [vmem:[%s2229_s22 + $0x170] sm:$0xff] %v1114_v21 }
 0x18c   : > { %v1436_v27 = vpop.f32.mrf.mxu3 }
 0x18f   : > { %v1272_v29 = vpop.f32.mrf.mxu2  ;;  %v1121_v33 = vpop.f32.mrf.mxu1 }
 0x190   : > { %v1432_v30 = vadd.f32 %v1431_v9, %v1272_v29  ;;  %v957_v31 = vpop.f32.mrf.mxu0 }
 0x191   : > { %v1117_v32 = vadd.f32 %v1116_v16, %v957_v31  ;;  %2084 = vmatmul.msk.bf16.gmra.mxu3 %vm797_vm3, %v1888_v28  ;;  %v2164_v16 = vld [vmem:[%s2224_s19 + $0x174] sm:$0xf0]  ;;  %v1917_v31 = vld [vmem:[%s2224_s19 + $0x198] sm:$0xf0] }
 0x192   : > { %1572 = vst.msk [vmem:[%s2229_s22 + $0x178] sm:$0xff] %vm1525_vm4, %v1432_v30  ;;  %2054 = vmatmul.msk.bf16.gmra.mxu1 %vm797_vm3, %v1888_v28  ;;  %v1900_v20 = vor.u32 %v2164_v16, %v1899_v15  ;;  %v2167_v30 = vld [vmem:[%s2224_s19 + $0x194] sm:$0xf] }
 0x193   : > { %1573 = vst [vmem:[%s2229_s22 + $0x180] sm:$0xff] %v1117_v32  ;;  %996 = vmatmul.bf16.gmra.mxu0 %v1876_v5  ;;  %v1907_v32 = vld [vmem:[%s2224_s19 + $0x180] sm:$0xf] }
 0x194   : > { %1314 = vmatmul.bf16.gmra.mxu2 %v1876_v5  ;;  %v1439_v34 = vpop.f32.mrf.mxu3 }
 0x197   : > { %v1275_v35 = vpop.f32.mrf.mxu2  ;;  %v1123_v39 = vpop.f32.mrf.mxu1 }
 0x198   : > { %v1435_v36 = vadd.f32 %v1434_v17, %v1275_v35  ;;  %v959_v37 = vpop.f32.mrf.mxu0  ;;  %v1920_v35 = vor.u32 %v2167_v30, %v1917_v31 }
 0x199   : > { %v1119_v38 = vadd.f32 %v1118_v22, %v959_v37 }
 0x19a   : > { %1574 = vst.msk [vmem:[%s2229_s22 + $0x188] sm:$0xff] %vm1525_vm4, %v1435_v36 }
 0x19b   : > { %1575 = vst [vmem:[%s2229_s22 + $0x190] sm:$0xff] %v1119_v38 }
 0x19c   : > { %v1441_v44 = vpop.f32.mrf.mxu3 }
 0x19f   : > { %v1277_v46 = vpop.f32.mrf.mxu2  ;;  %v1126_v51 = vpop.f32.mrf.mxu1 }
 0x1a0   : > { %v1437_v48 = vadd.f32 %v1436_v27, %v1277_v46  ;;  %v962_v49 = vpop.f32.mrf.mxu0 }
 0x1a1   : > { %v1122_v50 = vadd.f32 %v1121_v33, %v962_v49  ;;  %2085 = vmatmul.msk.bf16.gmra.mxu3 %vm797_vm3, %v1896_v45  ;;  %v2166_v33 = vld [vmem:[%s2224_s19 + $0x184] sm:$0xf0]  ;;  %v1925_v49 = vld [vmem:[%s2224_s19 + $0x1a8] sm:$0xf0] }
 0x1a2   : > { %1576 = vst.msk [vmem:[%s2229_s22 + $0x198] sm:$0xff] %vm1525_vm4, %v1437_v48  ;;  %2055 = vmatmul.msk.bf16.gmra.mxu1 %vm797_vm3, %v1896_v45  ;;  %v1908_v37 = vor.u32 %v2166_v33, %v1907_v32  ;;  %v2169_v48 = vld [vmem:[%s2224_s19 + $0x1a4] sm:$0xf] }
 0x1a3   : > { %1577 = vst [vmem:[%s2229_s22 + $0x1a0] sm:$0xff] %v1122_v50  ;;  %1001 = vmatmul.bf16.gmra.mxu0 %v1884_v47  ;;  %v1915_v50 = vld [vmem:[%s2224_s19 + $0x190] sm:$0xf] }
 0x1a4   : > { %1319 = vmatmul.bf16.gmra.mxu2 %v1884_v47  ;;  %v1444_v52 = vpop.f32.mrf.mxu3 }
 0x1a7   : > { %v1280_v53 = vpop.f32.mrf.mxu2  ;;  %v1128_v57 = vpop.f32.mrf.mxu1 }
 0x1a8   : > { %v1440_v54 = vadd.f32 %v1439_v34, %v1280_v53  ;;  %v964_v55 = vpop.f32.mrf.mxu0  ;;  %v1928_v53 = vor.u32 %v2169_v48, %v1925_v49 }
 0x1a9   : > { %v1124_v56 = vadd.f32 %v1123_v39, %v964_v55 }
 0x1aa   : > { %1578 = vst.msk [vmem:[%s2229_s22 + $0x1a8] sm:$0xff] %vm1525_vm4, %v1440_v54 }
 0x1ab   : > { %1579 = vst [vmem:[%s2229_s22 + $0x1b0] sm:$0xff] %v1124_v56 }
 0x1ac   : > { %v1446_v62 = vpop.f32.mrf.mxu3 }
 0x1af   : > { %v1282_v0 = vpop.f32.mrf.mxu2  ;;  %v1131_v6 = vpop.f32.mrf.mxu1 }
 0x1b0   : > { %v1442_v2 = vadd.f32 %v1441_v44, %v1282_v0  ;;  %v967_v3 = vpop.f32.mrf.mxu0 }
 0x1b1   : > { %v1127_v4 = vadd.f32 %v1126_v51, %v967_v3  ;;  %2086 = vmatmul.msk.bf16.gmra.mxu3 %vm797_vm3, %v1904_v63  ;;  %v2168_v51 = vld [vmem:[%s2224_s19 + $0x194] sm:$0xf0]  ;;  %v1933_v3 = vld [vmem:[%s2224_s19 + $0x1b8] sm:$0xf0] }
 0x1b2   : > { %1580 = vst.msk [vmem:[%s2229_s22 + $0x1b8] sm:$0xff] %vm1525_vm4, %v1442_v2  ;;  %2056 = vmatmul.msk.bf16.gmra.mxu1 %vm797_vm3, %v1904_v63  ;;  %v1916_v55 = vor.u32 %v2168_v51, %v1915_v50  ;;  %v2171_v2 = vld [vmem:[%s2224_s19 + $0x1b4] sm:$0xf] }
 0x1b3   : > { %1581 = vst [vmem:[%s2229_s22 + $0x1c0] sm:$0xff] %v1127_v4  ;;  %1006 = vmatmul.bf16.gmra.mxu0 %v1892_v1  ;;  %v1923_v4 = vld [vmem:[%s2224_s19 + $0x1a0] sm:$0xf] }
 0x1b4   : > { %1324 = vmatmul.bf16.gmra.mxu2 %v1892_v1  ;;  %v1449_v7 = vpop.f32.mrf.mxu3 }
 0x1b7   : > { %v1285_v8 = vpop.f32.mrf.mxu2  ;;  %v1133_v12 = vpop.f32.mrf.mxu1 }
 0x1b8   : > { %v1445_v9 = vadd.f32 %v1444_v52, %v1285_v8  ;;  %v969_v10 = vpop.f32.mrf.mxu0  ;;  %v1936_v8 = vor.u32 %v2171_v2, %v1933_v3 }
 0x1b9   : > { %v1129_v11 = vadd.f32 %v1128_v57, %v969_v10 }
 0x1ba   : > { %1582 = vst.msk [vmem:[%s2229_s22 + $0x1c8] sm:$0xff] %vm1525_vm4, %v1445_v9 }
 0x1bb   : > { %1583 = vst [vmem:[%s2229_s22 + $0x1d0] sm:$0xff] %v1129_v11 }
 0x1bc   : > { %v1451_v17 = vpop.f32.mrf.mxu3 }
 0x1bf   : > { %v1287_v19 = vpop.f32.mrf.mxu2  ;;  %v1136_v24 = vpop.f32.mrf.mxu1 }
 0x1c0   : > { %v1447_v21 = vadd.f32 %v1446_v62, %v1287_v19  ;;  %v972_v22 = vpop.f32.mrf.mxu0 }
 0x1c1   : > { %v1132_v23 = vadd.f32 %v1131_v6, %v972_v22  ;;  %2087 = vmatmul.msk.bf16.gmra.mxu3 %vm797_vm3, %v1912_v18  ;;  %v2170_v6 = vld [vmem:[%s2224_s19 + $0x1a4] sm:$0xf0]  ;;  %v1941_v22 = vld [vmem:[%s2224_s19 + $0x1c8] sm:$0xf0] }
 0x1c2   : > { %1584 = vst.msk [vmem:[%s2229_s22 + $0x1d8] sm:$0xff] %vm1525_vm4, %v1447_v21  ;;  %2057 = vmatmul.msk.bf16.gmra.mxu1 %vm797_vm3, %v1912_v18  ;;  %v1924_v10 = vor.u32 %v2170_v6, %v1923_v4  ;;  %v2173_v21 = vld [vmem:[%s2224_s19 + $0x1c4] sm:$0xf] }
 0x1c3   : > { %1585 = vst [vmem:[%s2229_s22 + $0x1e0] sm:$0xff] %v1132_v23  ;;  %1011 = vmatmul.bf16.gmra.mxu0 %v1900_v20  ;;  %v1931_v23 = vld [vmem:[%s2224_s19 + $0x1b0] sm:$0xf] }
 0x1c4   : > { %1329 = vmatmul.bf16.gmra.mxu2 %v1900_v20  ;;  %v1454_v25 = vpop.f32.mrf.mxu3 }
 0x1c7   : > { %v1290_v26 = vpop.f32.mrf.mxu2  ;;  %v1138_v5 = vpop.f32.mrf.mxu1 }
 0x1c8   : > { %v1450_v27 = vadd.f32 %v1449_v7, %v1290_v26  ;;  %v974_v28 = vpop.f32.mrf.mxu0  ;;  %v1944_v26 = vor.u32 %v2173_v21, %v1941_v22 }
 0x1c9   : > { %v1134_v29 = vadd.f32 %v1133_v12, %v974_v28 }
 0x1ca   : > { %1586 = vst.msk [vmem:[%s2229_s22 + $0x1e8] sm:$0xff] %vm1525_vm4, %v1450_v27 }
 0x1cb   : > { %1587 = vst [vmem:[%s2229_s22 + $0x1f0] sm:$0xff] %v1134_v29 }
 0x1cc   : > { %v1456_v34 = vpop.f32.mrf.mxu3 }
 0x1cf   : > { %v1292_v36 = vpop.f32.mrf.mxu2  ;;  %v1141_v41 = vpop.f32.mrf.mxu1 }
 0x1d0   : > { %v1452_v38 = vadd.f32 %v1451_v17, %v1292_v36  ;;  %v977_v39 = vpop.f32.mrf.mxu0 }
 0x1d1   : > { %v1137_v40 = vadd.f32 %v1136_v24, %v977_v39  ;;  %2088 = vmatmul.msk.bf16.gmra.mxu3 %vm797_vm3, %v1920_v35  ;;  %v2172_v24 = vld [vmem:[%s2224_s19 + $0x1b4] sm:$0xf0]  ;;  %v1949_v39 = vld [vmem:[%s2224_s19 + $0x1d8] sm:$0xf0] }
 0x1d2   : > { %1588 = vst.msk [vmem:[%s2229_s22 + $0x1f8] sm:$0xff] %vm1525_vm4, %v1452_v38  ;;  %2058 = vmatmul.msk.bf16.gmra.mxu1 %vm797_vm3, %v1920_v35  ;;  %v1932_v28 = vor.u32 %v2172_v24, %v1931_v23  ;;  %v2175_v38 = vld [vmem:[%s2224_s19 + $0x1d4] sm:$0xf] }
 0x1d3   : > { %1589 = vst [vmem:[%s2229_s22 + $0x200] sm:$0xff] %v1137_v40  ;;  %1016 = vmatmul.bf16.gmra.mxu0 %v1908_v37  ;;  %v1939_v40 = vld [vmem:[%s2224_s19 + $0x1c0] sm:$0xf] }
 0x1d4   : > { %1334 = vmatmul.bf16.gmra.mxu2 %v1908_v37  ;;  %v1459_v42 = vpop.f32.mrf.mxu3 }
 0x1d7   : > { %v1295_v43 = vpop.f32.mrf.mxu2  ;;  %v1143_v47 = vpop.f32.mrf.mxu1 }
 0x1d8   : > { %v1455_v44 = vadd.f32 %v1454_v25, %v1295_v43  ;;  %v979_v45 = vpop.f32.mrf.mxu0  ;;  %v1952_v43 = vor.u32 %v2175_v38, %v1949_v39 }
 0x1d9   : > { %v1139_v46 = vadd.f32 %v1138_v5, %v979_v45 }
 0x1da   : > { %1590 = vst.msk [vmem:[%s2229_s22 + $0x208] sm:$0xff] %vm1525_vm4, %v1455_v44 }
 0x1db   : > { %1591 = vst [vmem:[%s2229_s22 + $0x210] sm:$0xff] %v1139_v46 }
 0x1dc   : > { %v1461_v52 = vpop.f32.mrf.mxu3 }
 0x1df   : > { %v1297_v54 = vpop.f32.mrf.mxu2  ;;  %v1146_v59 = vpop.f32.mrf.mxu1 }
 0x1e0   : > { %v1457_v56 = vadd.f32 %v1456_v34, %v1297_v54  ;;  %v982_v57 = vpop.f32.mrf.mxu0 }
 0x1e1   : > { %v1142_v58 = vadd.f32 %v1141_v41, %v982_v57  ;;  %2089 = vmatmul.msk.bf16.gmra.mxu3 %vm797_vm3, %v1928_v53  ;;  %v2174_v41 = vld [vmem:[%s2224_s19 + $0x1c4] sm:$0xf0]  ;;  %v2176_v57 = vld [vmem:[%s2224_s19 + $0x1d4] sm:$0xf0] }
 0x1e2   : > { %1592 = vst.msk [vmem:[%s2229_s22 + $0x218] sm:$0xff] %vm1525_vm4, %v1457_v56  ;;  %2059 = vmatmul.msk.bf16.gmra.mxu1 %vm797_vm3, %v1928_v53  ;;  %v1940_v45 = vor.u32 %v2174_v41, %v1939_v40  ;;  %v1947_v56 = vld [vmem:[%s2224_s19 + $0x1d0] sm:$0xf] }
 0x1e3   : > { %1593 = vst [vmem:[%s2229_s22 + $0x220] sm:$0xff] %v1142_v58  ;;  %1021 = vmatmul.bf16.gmra.mxu0 %v1916_v55 }
 0x1e4   : > { %1339 = vmatmul.bf16.gmra.mxu2 %v1916_v55  ;;  %v1464_v60 = vpop.f32.mrf.mxu3 }
 0x1e7   : > { %v1300_v61 = vpop.f32.mrf.mxu2  ;;  %v1148_v1 = vpop.f32.mrf.mxu1 }
 0x1e8   : > { %v1460_v62 = vadd.f32 %v1459_v42, %v1300_v61  ;;  %v984_v63 = vpop.f32.mrf.mxu0 }
 0x1e9   : > { %v1144_v0 = vadd.f32 %v1143_v47, %v984_v63 }
 0x1ea   : > { %1594 = vst.msk [vmem:[%s2229_s22 + $0x228] sm:$0xff] %vm1525_vm4, %v1460_v62 }
 0x1eb   : > { %1595 = vst [vmem:[%s2229_s22 + $0x230] sm:$0xff] %v1144_v0 }
 0x1ec   : > { %v1466_v7 = vpop.f32.mrf.mxu3 }
 0x1ef   : > { %v1302_v9 = vpop.f32.mrf.mxu2  ;;  %v1151_v14 = vpop.f32.mrf.mxu1 }
 0x1f0   : > { %v1462_v11 = vadd.f32 %v1461_v52, %v1302_v9  ;;  %v987_v12 = vpop.f32.mrf.mxu0 }
 0x1f1   : > { %v1147_v13 = vadd.f32 %v1146_v59, %v987_v12  ;;  %2090 = vmatmul.msk.bf16.gmra.mxu3 %vm797_vm3, %v1936_v8 }
 0x1f2   : > { %1596 = vst.msk [vmem:[%s2229_s22 + $0x238] sm:$0xff] %vm1525_vm4, %v1462_v11  ;;  %2060 = vmatmul.msk.bf16.gmra.mxu1 %vm797_vm3, %v1936_v8 }
 0x1f3   : > { %1597 = vst [vmem:[%s2229_s22 + $0x240] sm:$0xff] %v1147_v13  ;;  %1026 = vmatmul.bf16.gmra.mxu0 %v1924_v10 }
 0x1f4   : > { %1344 = vmatmul.bf16.gmra.mxu2 %v1924_v10  ;;  %v1469_v15 = vpop.f32.mrf.mxu3 }
 0x1f7   : > { %v1305_v16 = vpop.f32.mrf.mxu2  ;;  %v1153_v20 = vpop.f32.mrf.mxu1 }
 0x1f8   : > { %v1465_v17 = vadd.f32 %v1464_v60, %v1305_v16  ;;  %v989_v18 = vpop.f32.mrf.mxu0  ;;  %v1948_v60 = vor.u32 %v2176_v57, %v1947_v56 }
 0x1f9   : > { %v1149_v19 = vadd.f32 %v1148_v1, %v989_v18 }
 0x1fa   : > { %1598 = vst.msk [vmem:[%s2229_s22 + $0x248] sm:$0xff] %vm1525_vm4, %v1465_v17 }
 0x1fb   : > { %1599 = vst [vmem:[%s2229_s22 + $0x250] sm:$0xff] %v1149_v19 }
 0x1fc   : > { %v1471_v25 = vpop.f32.mrf.mxu3 }
 0x1ff   : > { %v1307_v27 = vpop.f32.mrf.mxu2  ;;  %v1156_v31 = vpop.f32.mrf.mxu1 }
 0x200   : > { %v1467_v29 = vadd.f32 %v1466_v7, %v1307_v27  ;;  %v992_v5 = vpop.f32.mrf.mxu0 }
 0x201   : > { %v1152_v30 = vadd.f32 %v1151_v14, %v992_v5  ;;  %2091 = vmatmul.msk.bf16.gmra.mxu3 %vm797_vm3, %v1944_v26 }
 0x202   : > { %1600 = vst.msk [vmem:[%s2229_s22 + $0x258] sm:$0xff] %vm1525_vm4, %v1467_v29  ;;  %2061 = vmatmul.msk.bf16.gmra.mxu1 %vm797_vm3, %v1944_v26 }
 0x203   : > { %1601 = vst [vmem:[%s2229_s22 + $0x260] sm:$0xff] %v1152_v30  ;;  %1031 = vmatmul.bf16.gmra.mxu0 %v1932_v28 }
 0x204   : > { %1349 = vmatmul.bf16.gmra.mxu2 %v1932_v28  ;;  %v1474_v32 = vpop.f32.mrf.mxu3 }
 0x207   : > { %v1310_v33 = vpop.f32.mrf.mxu2  ;;  %v1158_v37 = vpop.f32.mrf.mxu1 }
 0x208   : > { %v1470_v34 = vadd.f32 %v1469_v15, %v1310_v33  ;;  %v994_v35 = vpop.f32.mrf.mxu0 }
 0x209   : > { %v1154_v36 = vadd.f32 %v1153_v20, %v994_v35 }
 0x20a   : > { %1602 = vst.msk [vmem:[%s2229_s22 + $0x268] sm:$0xff] %vm1525_vm4, %v1470_v34 }
 0x20b   : > { %1603 = vst [vmem:[%s2229_s22 + $0x270] sm:$0xff] %v1154_v36 }
 0x20c   : > { %v1476_v42 = vpop.f32.mrf.mxu3 }
 0x20f   : > { %v1312_v44 = vpop.f32.mrf.mxu2  ;;  %v1161_v49 = vpop.f32.mrf.mxu1 }
 0x210   : > { %v1472_v46 = vadd.f32 %v1471_v25, %v1312_v44  ;;  %v997_v47 = vpop.f32.mrf.mxu0 }
 0x211   : > { %v1157_v48 = vadd.f32 %v1156_v31, %v997_v47  ;;  %2092 = vmatmul.msk.bf16.gmra.mxu3 %vm797_vm3, %v1952_v43 }
 0x212   : > { %1604 = vst.msk [vmem:[%s2229_s22 + $0x278] sm:$0xff] %vm1525_vm4, %v1472_v46  ;;  %2062 = vmatmul.msk.bf16.gmra.mxu1 %vm797_vm3, %v1952_v43 }
 0x213   : > { %1605 = vst [vmem:[%s2229_s22 + $0x280] sm:$0xff] %v1157_v48  ;;  %1036 = vmatmul.bf16.gmra.mxu0 %v1940_v45 }
 0x214   : > { %1354 = vmatmul.bf16.gmra.mxu2 %v1940_v45  ;;  %v1479_v50 = vpop.f32.mrf.mxu3 }
 0x217   : > { %v1315_v51 = vpop.f32.mrf.mxu2  ;;  %v1163_v55 = vpop.f32.mrf.mxu1 }
 0x218   : > { %v1475_v52 = vadd.f32 %v1474_v32, %v1315_v51  ;;  %v999_v53 = vpop.f32.mrf.mxu0 }
 0x219   : > { %v1159_v54 = vadd.f32 %v1158_v37, %v999_v53 }
 0x21a   : > { %1606 = vst.msk [vmem:[%s2229_s22 + $0x288] sm:$0xff] %vm1525_vm4, %v1475_v52 }
 0x21b   : > { %1607 = vst [vmem:[%s2229_s22 + $0x290] sm:$0xff] %v1159_v54 }
 0x21c   : > { %v1481_v58 = vpop.f32.mrf.mxu3 }
 0x21f   : > { %v1317_v59 = vpop.f32.mrf.mxu2  ;;  %v1166_v0 = vpop.f32.mrf.mxu1 }
 0x220   : > { %v1477_v61 = vadd.f32 %v1476_v42, %v1317_v59  ;;  %v1002_v62 = vpop.f32.mrf.mxu0 }
 0x221   : > { %v1162_v63 = vadd.f32 %v1161_v49, %v1002_v62 }
 0x222   : > { %1608 = vst.msk [vmem:[%s2229_s22 + $0x298] sm:$0xff] %vm1525_vm4, %v1477_v61 }
 0x223   : > { %1609 = vst [vmem:[%s2229_s22 + $0x2a0] sm:$0xff] %v1162_v63  ;;  %1041 = vmatmul.bf16.gmra.mxu0 %v1948_v60 }
 0x224   : > { %1359 = vmatmul.bf16.gmra.mxu2 %v1948_v60  ;;  %v1484_v1 = vpop.f32.mrf.mxu3 }
 0x227   : > { %v1320_v2 = vpop.f32.mrf.mxu2  ;;  %v1168_v7 = vpop.f32.mrf.mxu1 }
 0x228   : > { %v1480_v3 = vadd.f32 %v1479_v50, %v1320_v2  ;;  %v1004_v4 = vpop.f32.mrf.mxu0 }
 0x229   : > { %v1164_v6 = vadd.f32 %v1163_v55, %v1004_v4 }
 0x22a   : > { %1610 = vst.msk [vmem:[%s2229_s22 + $0x2a8] sm:$0xff] %vm1525_vm4, %v1480_v3 }
 0x22b   : > { %1611 = vst [vmem:[%s2229_s22 + $0x2b0] sm:$0xff] %v1164_v6 }
 0x22c   : > { %v1486_v8 = vpop.f32.mrf.mxu3 }
 0x22f   : > { %v1322_v9 = vpop.f32.mrf.mxu2  ;;  %v1171_v13 = vpop.f32.mrf.mxu1 }
 0x230   : > { %v1482_v10 = vadd.f32 %v1481_v58, %v1322_v9  ;;  %v1007_v11 = vpop.f32.mrf.mxu0 }
 0x231   : > { %v1167_v12 = vadd.f32 %v1166_v0, %v1007_v11 }
 0x232   : > { %1612 = vst.msk [vmem:[%s2229_s22 + $0x2b8] sm:$0xff] %vm1525_vm4, %v1482_v10 }
 0x233   : > { %1613 = vst [vmem:[%s2229_s22 + $0x2c0] sm:$0xff] %v1167_v12 }
 0x234   : > { %v1489_v14 = vpop.f32.mrf.mxu3 }
 0x237   : > { %v1325_v15 = vpop.f32.mrf.mxu2  ;;  %v1173_v19 = vpop.f32.mrf.mxu1 }
 0x238   : > { %v1485_v16 = vadd.f32 %v1484_v1, %v1325_v15  ;;  %v1009_v17 = vpop.f32.mrf.mxu0 }
 0x239   : > { %v1169_v18 = vadd.f32 %v1168_v7, %v1009_v17 }
 0x23a   : > { %1614 = vst.msk [vmem:[%s2229_s22 + $0x2c8] sm:$0xff] %vm1525_vm4, %v1485_v16 }
 0x23b   : > { %1615 = vst [vmem:[%s2229_s22 + $0x2d0] sm:$0xff] %v1169_v18 }
 0x23c   : > { %v1491_v20 = vpop.f32.mrf.mxu3 }
 0x23f   : > { %v1327_v21 = vpop.f32.mrf.mxu2  ;;  %v1176_v25 = vpop.f32.mrf.mxu1 }
 0x240   : > { %v1487_v22 = vadd.f32 %v1486_v8, %v1327_v21  ;;  %v1012_v23 = vpop.f32.mrf.mxu0 }
 0x241   : > { %v1172_v24 = vadd.f32 %v1171_v13, %v1012_v23 }
 0x242   : > { %1616 = vst.msk [vmem:[%s2229_s22 + $0x2d8] sm:$0xff] %vm1525_vm4, %v1487_v22 }
 0x243   : > { %1617 = vst [vmem:[%s2229_s22 + $0x2e0] sm:$0xff] %v1172_v24 }
 0x244   : > { %v1494_v26 = vpop.f32.mrf.mxu3 }
 0x247   : > { %v1330_v27 = vpop.f32.mrf.mxu2  ;;  %v1178_v30 = vpop.f32.mrf.mxu1 }
 0x248   : > { %v1490_v28 = vadd.f32 %v1489_v14, %v1330_v27  ;;  %v1014_v29 = vpop.f32.mrf.mxu0 }
 0x249   : > { %v1174_v5 = vadd.f32 %v1173_v19, %v1014_v29 }
 0x24a   : > { %1618 = vst.msk [vmem:[%s2229_s22 + $0x2e8] sm:$0xff] %vm1525_vm4, %v1490_v28 }
 0x24b   : > { %1619 = vst [vmem:[%s2229_s22 + $0x2f0] sm:$0xff] %v1174_v5 }
 0x24c   : > { %v1496_v31 = vpop.f32.mrf.mxu3 }
 0x24f   : > { %v1332_v32 = vpop.f32.mrf.mxu2  ;;  %v1181_v36 = vpop.f32.mrf.mxu1 }
 0x250   : > { %v1492_v33 = vadd.f32 %v1491_v20, %v1332_v32  ;;  %v1017_v34 = vpop.f32.mrf.mxu0 }
 0x251   : > { %v1177_v35 = vadd.f32 %v1176_v25, %v1017_v34 }
 0x252   : > { %1620 = vst.msk [vmem:[%s2229_s22 + $0x2f8] sm:$0xff] %vm1525_vm4, %v1492_v33 }
 0x253   : > { %1621 = vst [vmem:[%s2229_s22 + $0x300] sm:$0xff] %v1177_v35 }
 0x254   : > { %v1499_v37 = vpop.f32.mrf.mxu3 }
 0x257   : > { %v1335_v38 = vpop.f32.mrf.mxu2  ;;  %v1183_v42 = vpop.f32.mrf.mxu1 }
 0x258   : > { %v1495_v39 = vadd.f32 %v1494_v26, %v1335_v38  ;;  %v1019_v40 = vpop.f32.mrf.mxu0 }
 0x259   : > { %v1179_v41 = vadd.f32 %v1178_v30, %v1019_v40 }
 0x25a   : > { %1622 = vst.msk [vmem:[%s2229_s22 + $0x308] sm:$0xff] %vm1525_vm4, %v1495_v39 }
 0x25b   : > { %1623 = vst [vmem:[%s2229_s22 + $0x310] sm:$0xff] %v1179_v41 }
 0x25c   : > { %v1501_v44 = vpop.f32.mrf.mxu3 }
 0x25f   : > { %v1337_v43 = vpop.f32.mrf.mxu2  ;;  %v1186_v48 = vpop.f32.mrf.mxu1 }
 0x260   : > { %v1497_v45 = vadd.f32 %v1496_v31, %v1337_v43  ;;  %v1022_v46 = vpop.f32.mrf.mxu0 }
 0x261   : > { %v1182_v47 = vadd.f32 %v1181_v36, %v1022_v46 }
 0x262   : > { %1624 = vst.msk [vmem:[%s2229_s22 + $0x318] sm:$0xff] %vm1525_vm4, %v1497_v45 }
 0x263   : > { %1625 = vst [vmem:[%s2229_s22 + $0x320] sm:$0xff] %v1182_v47 }
 0x264   : > { %v1504_v53 = vpop.f32.mrf.mxu3 }
 0x267   : > { %v1340_v49 = vpop.f32.mrf.mxu2  ;;  %v1188_v54 = vpop.f32.mrf.mxu1 }
 0x268   : > { %v1500_v50 = vadd.f32 %v1499_v37, %v1340_v49  ;;  %v1024_v51 = vpop.f32.mrf.mxu0 }
 0x269   : > { %v1184_v52 = vadd.f32 %v1183_v42, %v1024_v51 }
 0x26a   : > { %1626 = vst.msk [vmem:[%s2229_s22 + $0x328] sm:$0xff] %vm1525_vm4, %v1500_v50 }
 0x26b   : > { %1627 = vst [vmem:[%s2229_s22 + $0x330] sm:$0xff] %v1184_v52 }
 0x26c   : > { %v1506_v59 = vpop.f32.mrf.mxu3 }
 0x26f   : > { %v1342_v55 = vpop.f32.mrf.mxu2  ;;  %v1191_v60 = vpop.f32.mrf.mxu1 }
 0x270   : > { %v1502_v56 = vadd.f32 %v1501_v44, %v1342_v55  ;;  %v1027_v57 = vpop.f32.mrf.mxu0 }
 0x271   : > { %v1187_v58 = vadd.f32 %v1186_v48, %v1027_v57 }
 0x272   : > { %1628 = vst.msk [vmem:[%s2229_s22 + $0x338] sm:$0xff] %vm1525_vm4, %v1502_v56 }
 0x273   : > { %1629 = vst [vmem:[%s2229_s22 + $0x340] sm:$0xff] %v1187_v58 }
 0x274   : > { %v1509_v1 = vpop.f32.mrf.mxu3 }
 0x277   : > { %v1345_v61 = vpop.f32.mrf.mxu2  ;;  %v1193_v6 = vpop.f32.mrf.mxu1 }
 0x278   : > { %v1505_v62 = vadd.f32 %v1504_v53, %v1345_v61  ;;  %v1029_v63 = vpop.f32.mrf.mxu0 }
 0x279   : > { %v1189_v0 = vadd.f32 %v1188_v54, %v1029_v63 }
 0x27a   : > { %1630 = vst.msk [vmem:[%s2229_s22 + $0x348] sm:$0xff] %vm1525_vm4, %v1505_v62 }
 0x27b   : > { %1631 = vst [vmem:[%s2229_s22 + $0x350] sm:$0xff] %v1189_v0 }
 0x27c   : > { %v1511_v9 = vpop.f32.mrf.mxu3 }
 0x27f   : > { %v1347_v2 = vpop.f32.mrf.mxu2  ;;  %v1196_v13 = vpop.f32.mrf.mxu1 }
 0x280   : > { %v1507_v3 = vadd.f32 %v1506_v59, %v1347_v2  ;;  %v1032_v4 = vpop.f32.mrf.mxu0 }
 0x281   : > { %v1192_v7 = vadd.f32 %v1191_v60, %v1032_v4 }
 0x282   : > { %1632 = vst.msk [vmem:[%s2229_s22 + $0x358] sm:$0xff] %vm1525_vm4, %v1507_v3 }
 0x283   : > { %1633 = vst [vmem:[%s2229_s22 + $0x360] sm:$0xff] %v1192_v7 }
 0x284   : > { %v1514_v17 = vpop.f32.mrf.mxu3 }
 0x287   : > { %v1350_v8 = vpop.f32.mrf.mxu2  ;;  %v1198_v19 = vpop.f32.mrf.mxu1 }
 0x288   : > { %v1510_v10 = vadd.f32 %v1509_v1, %v1350_v8  ;;  %v1034_v11 = vpop.f32.mrf.mxu0 }
 0x289   : > { %v1194_v12 = vadd.f32 %v1193_v6, %v1034_v11 }
 0x28a   : > { %1634 = vst.msk [vmem:[%s2229_s22 + $0x368] sm:$0xff] %vm1525_vm4, %v1510_v10 }
 0x28b   : > { %1635 = vst [vmem:[%s2229_s22 + $0x370] sm:$0xff] %v1194_v12 }
 0x28c   : > { %v1516_v24 = vpop.f32.mrf.mxu3 }
 0x28f   : > { %v1352_v14 = vpop.f32.mrf.mxu2  ;;  %v1201_v25 = vpop.f32.mrf.mxu1 }
 0x290   : > { %v1512_v15 = vadd.f32 %v1511_v9, %v1352_v14  ;;  %v1037_v16 = vpop.f32.mrf.mxu0 }
 0x291   : > { %v1197_v18 = vadd.f32 %v1196_v13, %v1037_v16 }
 0x292   : > { %1636 = vst.msk [vmem:[%s2229_s22 + $0x378] sm:$0xff] %vm1525_vm4, %v1512_v15 }
 0x293   : > { %1637 = vst [vmem:[%s2229_s22 + $0x380] sm:$0xff] %v1197_v18 }
 0x294   : > { %v1519_v5 = vpop.f32.mrf.mxu3 }
 0x297   : > { %v1355_v20 = vpop.f32.mrf.mxu2  ;;  %v1203_v31 = vpop.f32.mrf.mxu1 }
 0x298   : > { %v1515_v21 = vadd.f32 %v1514_v17, %v1355_v20  ;;  %v1039_v22 = vpop.f32.mrf.mxu0 }
 0x299   : > { %v1199_v23 = vadd.f32 %v1198_v19, %v1039_v22 }
 0x29a   : > { %1638 = vst.msk [vmem:[%s2229_s22 + $0x388] sm:$0xff] %vm1525_vm4, %v1515_v21 }
 0x29b   : > { %1639 = vst [vmem:[%s2229_s22 + $0x390] sm:$0xff] %v1199_v23 }
 0x29c   : > { %v1521_v35 = vpop.f32.mrf.mxu3 }
 0x29f   : > { %v1357_v26 = vpop.f32.mrf.mxu2 }
 0x2a0   : > { %v1517_v27 = vadd.f32 %v1516_v24, %v1357_v26  ;;  %v1042_v28 = vpop.f32.mrf.mxu0 }
 0x2a1   : > { %v1202_v29 = vadd.f32 %v1201_v25, %v1042_v28 }
 0x2a2   : > { %1640 = vst.msk [vmem:[%s2229_s22 + $0x398] sm:$0xff] %vm1525_vm4, %v1517_v27 }
 0x2a3   : > { %1641 = vst [vmem:[%s2229_s22 + $0x3a0] sm:$0xff] %v1202_v29 }
 0x2a7   : > { %v1360_v30 = vpop.f32.mrf.mxu2 }
 0x2a8   : > { %v1520_v32 = vadd.f32 %v1519_v5, %v1360_v30  ;;  %v1044_v33 = vpop.f32.mrf.mxu0 }
 0x2a9   : > { %v1204_v34 = vadd.f32 %v1203_v31, %v1044_v33 }
 0x2aa   : > { %1642 = vst.msk [vmem:[%s2229_s22 + $0x3a8] sm:$0xff] %vm1525_vm4, %v1520_v32 }
 0x2ab   : > { %1643 = vst [vmem:[%s2229_s22 + $0x3b0] sm:$0xff] %v1204_v34 }
 0x2af   : > { %v1362_v36 = vpop.f32.mrf.mxu2 }
 0x2b0   : > { %v1522_v37 = vadd.f32 %v1521_v35, %v1362_v36 }
 0x2b2   : > { %1644 = vst.msk [vmem:[%s2229_s22 + $0x3b8] sm:$0xff] %vm1525_vm4, %v1522_v37 }
 0x2b3 PF: > { %s13_s12 = sadd.s32 1, %s2191_s12  }
 0x2b4   : > { %p10_p5 = scmp.ge.s32.totalorder %s13_s12, 4  }
 0x2b6   :  { %12 = sbr.rel (!%p10_p5) target bundleno = 1 (0x1), region = 66 }

</bundles_post_ra>
